<compile_context>
chip_gen: v7x
topology: tpu7x:2x2x1
jax: 0.10.0
libtpu: 0.0.40
codegen_flags: <defaults>
</compile_context>

<pallas_src>
import functools
from itertools import combinations

import jax
import jax.numpy as jnp
import numpy as np
from jax.experimental import pallas as pl
from jax.experimental.pallas import tpu as pltpu


# ----------------------------- Pallas kernel --------------------------------
def afm_kernel(emb_ref, lr_ref, w1_ref, b1_ref, w2_ref, out_ref, *, pairs):
    """FMPlus attention + second-order interaction + final sigmoid.

    emb_ref: [F, D, TB]  field embeddings for this batch tile (batch on lanes)
    lr_ref:  [1, TB]     first-order (LogReg) logit
    w1_ref:  [A, D]      attention_net Linear #1 weight
    b1_ref:  [A, 1]      attention_net Linear #1 bias (column vector)
    w2_ref:  [1, A]      attention_net Linear #2 weight (no bias)
    out_ref: [1, TB]     y_pred = sigmoid(lr_logit + fm_logit)
    """
    # Upcast once; all VPU/EUP math stays in f32 (v5e has no bf16 VPU/EUP).
    emb = emb_ref[...].astype(jnp.float32)       # [F, D, TB]
    w1 = w1_ref[...]                             # [A, D]
    b1 = b1_ref[...]                             # [A, 1]
    w2 = w2_ref[...]                             # [1, A]

    num_pairs = len(pairs)
    tb = emb.shape[-1]

    # Pairwise interactions; pairs stacked along the lane axis -> [D, P*TB].
    # Every elementwise op below is fully lane-dense (TB lanes per pair chunk).
    pair_all = jnp.concatenate([emb[i] * emb[j] for (i, j) in pairs], axis=1)

    # Attention MLP fused into ONE matmul across all pairs (keeps MXU fed,
    # no per-pair transposes / bias broadcasts).
    h = jnp.dot(w1, pair_all, preferred_element_type=jnp.float32) + b1     # [A, P*TB]
    h = jnp.maximum(h, 0.0)
    s_flat = jnp.dot(w2, h, preferred_element_type=jnp.float32)            # [1, P*TB]

    # Single sublane reduction over D for all pairs at once.
    psum_flat = jnp.sum(pair_all, axis=0, keepdims=True)                   # [1, P*TB]

    # Repack per-pair rows onto the sublane axis -> [P, TB] (lane-dense softmax).
    scores = jnp.concatenate(
        [s_flat[:, p * tb:(p + 1) * tb] for p in range(num_pairs)], axis=0)
    psums = jnp.concatenate(
        [psum_flat[:, p * tb:(p + 1) * tb] for p in range(num_pairs)], axis=0)

    # Softmax over the pair axis (sublanes); batch stays on lanes.
    m = jnp.max(scores, axis=0, keepdims=True)                             # [1, TB]
    e = jnp.exp(scores - m)                                                # [P, TB]
    denom = jnp.sum(e, axis=0, keepdims=True)                              # [1, TB]
    attn = e * pl.reciprocal(denom, approx=True)                           # [P, TB]

    # sum_{p,d} pair[p,d,b]*attn[p,b] == sum_p attn[p,b] * psums[p,b]
    fm_logit = jnp.sum(attn * psums, axis=0, keepdims=True)                # [1, TB]

    out_ref[...] = jax.nn.sigmoid(lr_ref[...] + fm_logit)                  # lane-dense store


# ------------------------------ Wrapper --------------------------------------
def afm_forward_pallas(emb, lr_logit, w1, b1, w2, *, batch_tile=512):
    """emb: [B, F, D] (f32 or bf16), lr_logit: [B, 1]; returns y_pred [B, 1] f32."""
    B, F, D = emb.shape
    A = w1.shape[0]
    pairs = tuple(combinations(range(F), 2))

    # Batch tile: multiple of 128 for lane-dense blocks (or full B when tiny).
    if B >= 128:
        tb = max(128, (min(batch_tile, B) // 128) * 128)
    else:
        tb = B
    nblk = pl.cdiv(B, tb)
    Bp = nblk * tb

    # Batch-in-lanes layout (layout plumbing, done once outside the kernel).
    emb_t = jnp.transpose(emb, (1, 2, 0))                      # [F, D, B]
    lr_t = lr_logit.reshape(1, B).astype(jnp.float32)          # [1, B]
    if Bp != B:
        emb_t = jnp.pad(emb_t, ((0, 0), (0, 0), (0, Bp - B)))
        lr_t = jnp.pad(lr_t, ((0, 0), (0, Bp - B)))

    w1_f = w1.astype(jnp.float32)                              # [A, D]
    b1_col = b1.reshape(A, 1).astype(jnp.float32)              # [A, 1]
    w2_row = w2.reshape(1, A).astype(jnp.float32)              # [1, A]

    kernel = functools.partial(afm_kernel, pairs=pairs)
    out = pl.pallas_call(
        kernel,
        out_shape=jax.ShapeDtypeStruct((1, Bp), jnp.float32),
        grid_spec=pltpu.PrefetchScalarGridSpec(
            num_scalar_prefetch=0,
            grid=(nblk,),
            in_specs=[
                pl.BlockSpec((F, D, tb), lambda i: (0, 0, i)),   # embeddings (bf16 ok)
                pl.BlockSpec((1, tb), lambda i: (0, i)),         # lr logit
                pl.BlockSpec((A, D), lambda i: (0, 0)),          # W1
                pl.BlockSpec((A, 1), lambda i: (0, 0)),          # b1
                pl.BlockSpec((1, A), lambda i: (0, 0)),          # W2
            ],
            out_specs=pl.BlockSpec((1, tb), lambda i: (0, i)),
        ),
        # parallel batch axis -> Mosaic can shard grid steps across the two
        # TensorCores on v7x (keep >= 2 blocks when sizing batch_tile).
        compiler_params=pltpu.CompilerParams(
            dimension_semantics=("parallel",)),
    )(emb_t, lr_t, w1_f, b1_col, w2_row)

    return out[0, :B].reshape(B, 1)


# --------------------------- Pure-JAX reference -------------------------------
def afm_forward_ref(emb, lr_logit, w1, b1, w2):
    B, F, D = emb.shape
    pairs = list(combinations(range(F), 2))
    emb = emb.astype(jnp.float32)
    pair = jnp.stack([emb[:, i, :] * emb[:, j, :] for (i, j) in pairs], axis=1)  # [B,P,D]
    h = jnp.maximum(
        jnp.einsum('bpd,ad->bpa', pair, w1, precision=jax.lax.Precision.HIGHEST)
        + b1.reshape(1, 1, -1), 0.0)
    s = jnp.einsum('bpa,a->bp', h, w2.reshape(-1),
                   precision=jax.lax.Precision.HIGHEST)[..., None]               # [B,P,1]
    attn = jax.nn.softmax(s, axis=1)
    fm = jnp.sum(jnp.sum(pair * attn, axis=1), axis=-1, keepdims=True)           # [B,1]
    return jax.nn.sigmoid(lr_logit + fm)


# --------------------------------- Main ---------------------------------------
if __name__ == "__main__":
    # Synthetic config (mirrors AFM(embedding_dim=16, attention_factor=32)).
    B = 512        # batch (two 256-wide batch tiles -> exercises the grid)
    F = 5          # number of sparse fields  -> P = 10 pairs
    V = 100        # vocab size per field
    D = 16         # embedding_dim
    A = 32         # attention_factor
    L2_REG = 0.1

    key = jax.random.PRNGKey(0)
    keys = jax.random.split(key, 8)

    # ---- deterministic parameter init (shapes from the module __init__) ----
    emb_tables = 0.05 * jax.random.normal(keys[0], (F, V, D), jnp.float32)   # EmbeddingLayer
    lr_tables = 0.05 * jax.random.normal(keys[1], (F, V), jnp.float32)       # LogRegLayer weights
    lr_bias = jnp.zeros((1,), jnp.float32)                                   # LogRegLayer bias
    w1 = 0.1 * jax.random.normal(keys[2], (A, D), jnp.float32)               # attention_net[0].weight
    b1 = jnp.zeros((A,), jnp.float32)                                        # attention_net[0].bias
    w2 = 0.1 * jax.random.normal(keys[3], (1, A), jnp.float32)               # attention_net[2].weight

    # ---- synthetic input "data" dict: sparse ids + labels ----
    sparse_ids = jax.random.randint(keys[4], (B, F), 0, V)
    label = jax.random.randint(keys[5], (B, 1), 0, 2).astype(jnp.float32)

    # ---- glue: embedding lookups (EmbeddingLayer / LogRegLayer) ----
    emb = jnp.stack(
        [jnp.take(emb_tables[f], sparse_ids[:, f], axis=0) for f in range(F)], axis=1
    )                                                                        # [B, F, D]
    emb_bf16 = emb.astype(jnp.bfloat16)   # halve HBM traffic for the kernel input
    lr_logit = (
        sum(jnp.take(lr_tables[f], sparse_ids[:, f])[:, None] for f in range(F)) + lr_bias
    ).astype(jnp.float32)                                                    # [B, 1]

    # ---- Pallas kernel: FMPlus attention + sigmoid(lr + fm) ----
    y_pred = afm_forward_pallas(emb_bf16, lr_logit, w1, b1, w2, batch_tile=256)
    y_pred = jax.block_until_ready(y_pred)

    # ---- loss (glue, scalar): BCE(mean) + l2_reg * sum(W1^2) ----
    eps = 1e-7
    yp = jnp.clip(y_pred, eps, 1.0 - eps)
    bce = -(label * jnp.log(yp) + (1.0 - label) * jnp.log(1.0 - yp))
    loss = jnp.mean(bce) + L2_REG * jnp.sum(w1 ** 2)
    loss = jax.block_until_ready(loss)

    # ---- correctness check vs pure-JAX reference (same bf16-rounded emb) ----
    y_ref = afm_forward_ref(emb_bf16.astype(jnp.float32), lr_logit, w1, b1, w2)
    np.testing.assert_allclose(np.asarray(y_pred), np.asarray(y_ref), rtol=1e-3, atol=1e-4)

    print("KERNEL_OK")
</pallas_src>

<mosaic_0001>
module attributes {stable_mosaic.version = 11 : i64} {
  func.func @afm_kernel(%arg0: i32, %arg1: memref<5x16x256xbf16, #tpu.memory_space<vmem>>, %arg2: memref<1x256xf32, #tpu.memory_space<vmem>>, %arg3: memref<32x16xf32, #tpu.memory_space<vmem>>, %arg4: memref<32x1xf32, #tpu.memory_space<vmem>>, %arg5: memref<1x32xf32, #tpu.memory_space<vmem>>, %arg6: memref<1x256xf32, #tpu.memory_space<vmem>>) attributes {dimension_semantics = [#tpu.dimension_semantics<parallel>], iteration_bounds = array<i64: 2>, scalar_prefetch = 0 : i64, scratch_operands = 0 : i64, tpu.core_type = #tpu.core_type<tc>, window_params = [{transform_indices = @transform_0, window_bounds = array<i64: 5, 16, 256>}, {transform_indices = @transform_1, window_bounds = array<i64: 1, 256>}, {pipeline_mode = #tpu.pipeline_mode<synchronous>, transform_indices = @transform_2, window_bounds = array<i64: 32, 16>}, {pipeline_mode = #tpu.pipeline_mode<synchronous>, transform_indices = @transform_3, window_bounds = array<i64: 32, 1>}, {pipeline_mode = #tpu.pipeline_mode<synchronous>, transform_indices = @transform_4, window_bounds = array<i64: 1, 32>}, {transform_indices = @transform_5, window_bounds = array<i64: 1, 256>}]} {
    %c0 = arith.constant 0 : index
    %c0_0 = arith.constant 0 : index
    %c0_1 = arith.constant 0 : index
    %0 = vector.load %arg1[%c0, %c0_0, %c0_1] : memref<5x16x256xbf16, #tpu.memory_space<vmem>>, vector<5x16x256xbf16>
    %1 = arith.extf %0 : vector<5x16x256xbf16> to vector<5x16x256xf32>
    %c0_2 = arith.constant 0 : index
    %c0_3 = arith.constant 0 : index
    %2 = vector.load %arg3[%c0_2, %c0_3] : memref<32x16xf32, #tpu.memory_space<vmem>>, vector<32x16xf32>
    %c0_4 = arith.constant 0 : index
    %c0_5 = arith.constant 0 : index
    %3 = vector.load %arg4[%c0_4, %c0_5] : memref<32x1xf32, #tpu.memory_space<vmem>>, vector<32x1xf32>
    %c0_6 = arith.constant 0 : index
    %c0_7 = arith.constant 0 : index
    %4 = vector.load %arg5[%c0_6, %c0_7] : memref<1x32xf32, #tpu.memory_space<vmem>>, vector<1x32xf32>
    %5 = vector.extract_strided_slice %1 {offsets = [0, 0, 0], sizes = [1, 16, 256], strides = [1, 1, 1]} : vector<5x16x256xf32> to vector<1x16x256xf32>
    %6 = vector.shape_cast %5 : vector<1x16x256xf32> to vector<16x256xf32>
    %7 = vector.extract_strided_slice %1 {offsets = [1, 0, 0], sizes = [1, 16, 256], strides = [1, 1, 1]} : vector<5x16x256xf32> to vector<1x16x256xf32>
    %8 = vector.shape_cast %7 : vector<1x16x256xf32> to vector<16x256xf32>
    %9 = arith.mulf %6, %8 : vector<16x256xf32>
    %10 = vector.extract_strided_slice %1 {offsets = [0, 0, 0], sizes = [1, 16, 256], strides = [1, 1, 1]} : vector<5x16x256xf32> to vector<1x16x256xf32>
    %11 = vector.shape_cast %10 : vector<1x16x256xf32> to vector<16x256xf32>
    %12 = vector.extract_strided_slice %1 {offsets = [2, 0, 0], sizes = [1, 16, 256], strides = [1, 1, 1]} : vector<5x16x256xf32> to vector<1x16x256xf32>
    %13 = vector.shape_cast %12 : vector<1x16x256xf32> to vector<16x256xf32>
    %14 = arith.mulf %11, %13 : vector<16x256xf32>
    %15 = vector.extract_strided_slice %1 {offsets = [0, 0, 0], sizes = [1, 16, 256], strides = [1, 1, 1]} : vector<5x16x256xf32> to vector<1x16x256xf32>
    %16 = vector.shape_cast %15 : vector<1x16x256xf32> to vector<16x256xf32>
    %17 = vector.extract_strided_slice %1 {offsets = [3, 0, 0], sizes = [1, 16, 256], strides = [1, 1, 1]} : vector<5x16x256xf32> to vector<1x16x256xf32>
    %18 = vector.shape_cast %17 : vector<1x16x256xf32> to vector<16x256xf32>
    %19 = arith.mulf %16, %18 : vector<16x256xf32>
    %20 = vector.extract_strided_slice %1 {offsets = [0, 0, 0], sizes = [1, 16, 256], strides = [1, 1, 1]} : vector<5x16x256xf32> to vector<1x16x256xf32>
    %21 = vector.shape_cast %20 : vector<1x16x256xf32> to vector<16x256xf32>
    %22 = vector.extract_strided_slice %1 {offsets = [4, 0, 0], sizes = [1, 16, 256], strides = [1, 1, 1]} : vector<5x16x256xf32> to vector<1x16x256xf32>
    %23 = vector.shape_cast %22 : vector<1x16x256xf32> to vector<16x256xf32>
    %24 = arith.mulf %21, %23 : vector<16x256xf32>
    %25 = vector.extract_strided_slice %1 {offsets = [1, 0, 0], sizes = [1, 16, 256], strides = [1, 1, 1]} : vector<5x16x256xf32> to vector<1x16x256xf32>
    %26 = vector.shape_cast %25 : vector<1x16x256xf32> to vector<16x256xf32>
    %27 = vector.extract_strided_slice %1 {offsets = [2, 0, 0], sizes = [1, 16, 256], strides = [1, 1, 1]} : vector<5x16x256xf32> to vector<1x16x256xf32>
    %28 = vector.shape_cast %27 : vector<1x16x256xf32> to vector<16x256xf32>
    %29 = arith.mulf %26, %28 : vector<16x256xf32>
    %30 = vector.extract_strided_slice %1 {offsets = [1, 0, 0], sizes = [1, 16, 256], strides = [1, 1, 1]} : vector<5x16x256xf32> to vector<1x16x256xf32>
    %31 = vector.shape_cast %30 : vector<1x16x256xf32> to vector<16x256xf32>
    %32 = vector.extract_strided_slice %1 {offsets = [3, 0, 0], sizes = [1, 16, 256], strides = [1, 1, 1]} : vector<5x16x256xf32> to vector<1x16x256xf32>
    %33 = vector.shape_cast %32 : vector<1x16x256xf32> to vector<16x256xf32>
    %34 = arith.mulf %31, %33 : vector<16x256xf32>
    %35 = vector.extract_strided_slice %1 {offsets = [1, 0, 0], sizes = [1, 16, 256], strides = [1, 1, 1]} : vector<5x16x256xf32> to vector<1x16x256xf32>
    %36 = vector.shape_cast %35 : vector<1x16x256xf32> to vector<16x256xf32>
    %37 = vector.extract_strided_slice %1 {offsets = [4, 0, 0], sizes = [1, 16, 256], strides = [1, 1, 1]} : vector<5x16x256xf32> to vector<1x16x256xf32>
    %38 = vector.shape_cast %37 : vector<1x16x256xf32> to vector<16x256xf32>
    %39 = arith.mulf %36, %38 : vector<16x256xf32>
    %40 = vector.extract_strided_slice %1 {offsets = [2, 0, 0], sizes = [1, 16, 256], strides = [1, 1, 1]} : vector<5x16x256xf32> to vector<1x16x256xf32>
    %41 = vector.shape_cast %40 : vector<1x16x256xf32> to vector<16x256xf32>
    %42 = vector.extract_strided_slice %1 {offsets = [3, 0, 0], sizes = [1, 16, 256], strides = [1, 1, 1]} : vector<5x16x256xf32> to vector<1x16x256xf32>
    %43 = vector.shape_cast %42 : vector<1x16x256xf32> to vector<16x256xf32>
    %44 = arith.mulf %41, %43 : vector<16x256xf32>
    %45 = vector.extract_strided_slice %1 {offsets = [2, 0, 0], sizes = [1, 16, 256], strides = [1, 1, 1]} : vector<5x16x256xf32> to vector<1x16x256xf32>
    %46 = vector.shape_cast %45 : vector<1x16x256xf32> to vector<16x256xf32>
    %47 = vector.extract_strided_slice %1 {offsets = [4, 0, 0], sizes = [1, 16, 256], strides = [1, 1, 1]} : vector<5x16x256xf32> to vector<1x16x256xf32>
    %48 = vector.shape_cast %47 : vector<1x16x256xf32> to vector<16x256xf32>
    %49 = arith.mulf %46, %48 : vector<16x256xf32>
    %50 = vector.extract_strided_slice %1 {offsets = [3, 0, 0], sizes = [1, 16, 256], strides = [1, 1, 1]} : vector<5x16x256xf32> to vector<1x16x256xf32>
    %51 = vector.shape_cast %50 : vector<1x16x256xf32> to vector<16x256xf32>
    %52 = vector.extract_strided_slice %1 {offsets = [4, 0, 0], sizes = [1, 16, 256], strides = [1, 1, 1]} : vector<5x16x256xf32> to vector<1x16x256xf32>
    %53 = vector.shape_cast %52 : vector<1x16x256xf32> to vector<16x256xf32>
    %54 = arith.mulf %51, %53 : vector<16x256xf32>
    %55 = tpu.concatenate %9, %14, %19, %24, %29, %34, %39, %44, %49, %54 in 1 : vector<16x256xf32>, vector<16x256xf32>, vector<16x256xf32>, vector<16x256xf32>, vector<16x256xf32>, vector<16x256xf32>, vector<16x256xf32>, vector<16x256xf32>, vector<16x256xf32>, vector<16x256xf32> -> vector<16x2560xf32>
    %cst = arith.constant dense<0.000000e+00> : vector<32x2560xf32>
    %56 = tpu.matmul %2, %55, %cst {dimension_numbers = #tpu.dot_dimension_numbers<[1], [0], [0], [1], [0, 0, 1, 1], [], []>} : vector<32x16xf32>, vector<16x2560xf32>, vector<32x2560xf32> -> vector<32x2560xf32>
    %57 = vector.broadcast %3 : vector<32x1xf32> to vector<32x2560xf32>
    %58 = arith.addf %56, %57 : vector<32x2560xf32>
    %cst_8 = arith.constant 0.000000e+00 : f32
    %59 = vector.broadcast %cst_8 : f32 to vector<32x2560xf32>
    %60 = arith.maximumf %58, %59 : vector<32x2560xf32>
    %cst_9 = arith.constant dense<0.000000e+00> : vector<1x2560xf32>
    %61 = tpu.matmul %4, %60, %cst_9 {dimension_numbers = #tpu.dot_dimension_numbers<[1], [0], [0], [1], [0, 0, 1, 1], [], []>} : vector<1x32xf32>, vector<32x2560xf32>, vector<1x2560xf32> -> vector<1x2560xf32>
    %cst_10 = arith.constant dense<0.000000e+00> : vector<2560xf32>
    %62 = vector.multi_reduction <add>, %55, %cst_10 [0] : vector<16x2560xf32> to vector<2560xf32>
    %63 = vector.shape_cast %62 : vector<2560xf32> to vector<1x2560xf32>
    %64 = vector.extract_strided_slice %61 {offsets = [0, 0], sizes = [1, 256], strides = [1, 1]} : vector<1x2560xf32> to vector<1x256xf32>
    %65 = vector.extract_strided_slice %61 {offsets = [0, 256], sizes = [1, 256], strides = [1, 1]} : vector<1x2560xf32> to vector<1x256xf32>
    %66 = vector.extract_strided_slice %61 {offsets = [0, 512], sizes = [1, 256], strides = [1, 1]} : vector<1x2560xf32> to vector<1x256xf32>
    %67 = vector.extract_strided_slice %61 {offsets = [0, 768], sizes = [1, 256], strides = [1, 1]} : vector<1x2560xf32> to vector<1x256xf32>
    %68 = vector.extract_strided_slice %61 {offsets = [0, 1024], sizes = [1, 256], strides = [1, 1]} : vector<1x2560xf32> to vector<1x256xf32>
    %69 = vector.extract_strided_slice %61 {offsets = [0, 1280], sizes = [1, 256], strides = [1, 1]} : vector<1x2560xf32> to vector<1x256xf32>
    %70 = vector.extract_strided_slice %61 {offsets = [0, 1536], sizes = [1, 256], strides = [1, 1]} : vector<1x2560xf32> to vector<1x256xf32>
    %71 = vector.extract_strided_slice %61 {offsets = [0, 1792], sizes = [1, 256], strides = [1, 1]} : vector<1x2560xf32> to vector<1x256xf32>
    %72 = vector.extract_strided_slice %61 {offsets = [0, 2048], sizes = [1, 256], strides = [1, 1]} : vector<1x2560xf32> to vector<1x256xf32>
    %73 = vector.extract_strided_slice %61 {offsets = [0, 2304], sizes = [1, 256], strides = [1, 1]} : vector<1x2560xf32> to vector<1x256xf32>
    %74 = tpu.concatenate %64, %65, %66, %67, %68, %69, %70, %71, %72, %73 in 0 : vector<1x256xf32>, vector<1x256xf32>, vector<1x256xf32>, vector<1x256xf32>, vector<1x256xf32>, vector<1x256xf32>, vector<1x256xf32>, vector<1x256xf32>, vector<1x256xf32>, vector<1x256xf32> -> vector<10x256xf32>
    %75 = vector.extract_strided_slice %63 {offsets = [0, 0], sizes = [1, 256], strides = [1, 1]} : vector<1x2560xf32> to vector<1x256xf32>
    %76 = vector.extract_strided_slice %63 {offsets = [0, 256], sizes = [1, 256], strides = [1, 1]} : vector<1x2560xf32> to vector<1x256xf32>
    %77 = vector.extract_strided_slice %63 {offsets = [0, 512], sizes = [1, 256], strides = [1, 1]} : vector<1x2560xf32> to vector<1x256xf32>
    %78 = vector.extract_strided_slice %63 {offsets = [0, 768], sizes = [1, 256], strides = [1, 1]} : vector<1x2560xf32> to vector<1x256xf32>
    %79 = vector.extract_strided_slice %63 {offsets = [0, 1024], sizes = [1, 256], strides = [1, 1]} : vector<1x2560xf32> to vector<1x256xf32>
    %80 = vector.extract_strided_slice %63 {offsets = [0, 1280], sizes = [1, 256], strides = [1, 1]} : vector<1x2560xf32> to vector<1x256xf32>
    %81 = vector.extract_strided_slice %63 {offsets = [0, 1536], sizes = [1, 256], strides = [1, 1]} : vector<1x2560xf32> to vector<1x256xf32>
    %82 = vector.extract_strided_slice %63 {offsets = [0, 1792], sizes = [1, 256], strides = [1, 1]} : vector<1x2560xf32> to vector<1x256xf32>
    %83 = vector.extract_strided_slice %63 {offsets = [0, 2048], sizes = [1, 256], strides = [1, 1]} : vector<1x2560xf32> to vector<1x256xf32>
    %84 = vector.extract_strided_slice %63 {offsets = [0, 2304], sizes = [1, 256], strides = [1, 1]} : vector<1x2560xf32> to vector<1x256xf32>
    %85 = tpu.concatenate %75, %76, %77, %78, %79, %80, %81, %82, %83, %84 in 0 : vector<1x256xf32>, vector<1x256xf32>, vector<1x256xf32>, vector<1x256xf32>, vector<1x256xf32>, vector<1x256xf32>, vector<1x256xf32>, vector<1x256xf32>, vector<1x256xf32>, vector<1x256xf32> -> vector<10x256xf32>
    %cst_11 = arith.constant dense<0xFF800000> : vector<256xf32>
    %86 = vector.multi_reduction <maximumf>, %74, %cst_11 [0] : vector<10x256xf32> to vector<256xf32>
    %87 = vector.shape_cast %86 : vector<256xf32> to vector<1x256xf32>
    %88 = vector.broadcast %87 : vector<1x256xf32> to vector<10x256xf32>
    %89 = arith.subf %74, %88 : vector<10x256xf32>
    %90 = math.exp %89 : vector<10x256xf32>
    %cst_12 = arith.constant dense<0.000000e+00> : vector<256xf32>
    %91 = vector.multi_reduction <add>, %90, %cst_12 [0] : vector<10x256xf32> to vector<256xf32>
    %92 = vector.shape_cast %91 : vector<256xf32> to vector<1x256xf32>
    %93 = tpu.reciprocal %92 {approx = true} : vector<1x256xf32> -> vector<1x256xf32>
    %94 = vector.broadcast %93 : vector<1x256xf32> to vector<10x256xf32>
    %95 = arith.mulf %90, %94 : vector<10x256xf32>
    %96 = arith.mulf %95, %85 : vector<10x256xf32>
    %cst_13 = arith.constant dense<0.000000e+00> : vector<256xf32>
    %97 = vector.multi_reduction <add>, %96, %cst_13 [0] : vector<10x256xf32> to vector<256xf32>
    %98 = vector.shape_cast %97 : vector<256xf32> to vector<1x256xf32>
    %c0_14 = arith.constant 0 : index
    %c0_15 = arith.constant 0 : index
    %99 = vector.load %arg2[%c0_14, %c0_15] : memref<1x256xf32, #tpu.memory_space<vmem>>, vector<1x256xf32>
    %100 = arith.addf %99, %98 : vector<1x256xf32>
    %101 = arith.negf %100 : vector<1x256xf32>
    %102 = math.exp %101 : vector<1x256xf32>
    %cst_16 = arith.constant 1.000000e+00 : f32
    %103 = vector.broadcast %cst_16 : f32 to vector<1x256xf32>
    %104 = arith.addf %103, %102 : vector<1x256xf32>
    %105 = arith.divf %103, %104 : vector<1x256xf32>
    %c0_17 = arith.constant 0 : index
    %c0_18 = arith.constant 0 : index
    %106 = vector.load %arg6[%c0_17, %c0_18] : memref<1x256xf32, #tpu.memory_space<vmem>>, vector<1x256xf32>
    tpu.vector_store %arg6[%c0_17, %c0_18], %105 {strides = array<i32>} : memref<1x256xf32, #tpu.memory_space<vmem>>, vector<1x256xf32>,
    return
  }
  func.func @transform_0(%arg0: i32) -> (i32, i32, i32) {
    %c0_i32 = arith.constant 0 : i32
    %c0_i32_0 = arith.constant 0 : i32
    %c0_i32_1 = arith.constant 0 : i32
    return %c0_i32, %c0_i32_0, %arg0 : i32, i32, i32
  }
  func.func @transform_1(%arg0: i32) -> (i32, i32) {
    %c0_i32 = arith.constant 0 : i32
    %c0_i32_0 = arith.constant 0 : i32
    return %c0_i32, %arg0 : i32, i32
  }
  func.func @transform_2(%arg0: i32) -> (i32, i32) {
    %c0_i32 = arith.constant 0 : i32
    %c0_i32_0 = arith.constant 0 : i32
    %c0_i32_1 = arith.constant 0 : i32
    return %c0_i32, %c0_i32_0 : i32, i32
  }
  func.func @transform_3(%arg0: i32) -> (i32, i32) {
    %c0_i32 = arith.constant 0 : i32
    %c0_i32_0 = arith.constant 0 : i32
    %c0_i32_1 = arith.constant 0 : i32
    return %c0_i32, %c0_i32_0 : i32, i32
  }
  func.func @transform_4(%arg0: i32) -> (i32, i32) {
    %c0_i32 = arith.constant 0 : i32
    %c0_i32_0 = arith.constant 0 : i32
    %c0_i32_1 = arith.constant 0 : i32
    return %c0_i32, %c0_i32_0 : i32, i32
  }
  func.func @transform_5(%arg0: i32) -> (i32, i32) {
    %c0_i32 = arith.constant 0 : i32
    %c0_i32_0 = arith.constant 0 : i32
    return %c0_i32, %arg0 : i32, i32
  }
}

</mosaic_0001>

<bundles_post_ra>
// kernel: tpu_custom_call.1
= control target key start
LH: loop header
LB: loop body
LE: loop exit
PB: predicated region body
PF: predicated region fallthrough
CT: control target
= control target key end

     0   :  { %10 = vsyncpa [#allocation3], 0  ;;  %s3564_s0 = inlined_call_operand.hbm [shape: bf16[5,16,512], index: 0, kind: input, shape index: {}]   ;;  %s3565_s1 = inlined_call_operand.vmem [shape: f32[1,512], index: 1, kind: input, shape index: {}]   ;;  %s3566_s2 = inlined_call_operand.vmem [shape: f32[32,16], index: 2, kind: input, shape index: {}]   ;;  %s3567_s3 = inlined_call_operand.vmem [shape: f32[32,1], index: 3, kind: input, shape index: {}]   ;;  %s3568_s4 = inlined_call_operand.vmem [shape: f32[1,32], index: 4, kind: input, shape index: {}]   ;;  %s3569_s5 = inlined_call_operand.hbm [shape: f32[1,512], index: 5, kind: output, shape index: {}]  }
   0x1   :  { %12 = vsyncpa [#allocation3 + $0x1], 0 }
   0x2   :  { %13 = vsyncpa [#allocation4], 0 }
   0x3   :  { %15 = vsyncpa [#allocation4 + $0x1], 0  ;;  %s2876_s18 = smov 0   ;;  %s2878_s19 = smov 0  }
   0x4   :  { %s2880_s20 = smov 0   ;;  %s2882_s21 = smov 0  }
   0x5 LB: > { %s2897_s22 = sadd.s32 4294967295, %s2836_s21   ;;  %s2482_s23 = sadd.s32 4294967294, %s2836_s21   ;;  %s2836_s21 = sphi %s2882_s21, %s3582_s21   ;;  %s2832_s20 = sphi %s2880_s20, %s3581_s20   ;;  %s2828_s19 = sphi %s2878_s19, %s3580_s19   ;;  %s2824_s18 = sphi %s2876_s18, %s3579_s18  }
   0x6   : > { %s2901_s24 = sadd.s32 1, %s2836_s21   ;;  %s28_s25 = sadd.s32 1, %s2832_s20 }
   0x7   : > { %s25_s26 = ssub.s32 %s2836_s21, %s2901_s24  ;;  %p35_p0 = scmp.ne.s32.totalorder %s2832_s20, %s2828_s19 }
   0x8   : > { %p26_p1 = scmp.eq.s32.totalorder %s25_s26, 0  ;;  %p36_p2 = scmp.eq.s32.totalorder %s2836_s21, 0 }
   0x9   : > { %p41_p3 = scmp.ne.s32.totalorder %s2828_s19, %s2824_s18  ;;  %p42_p4 = scmp.eq.s32.totalorder %s2897_s22, 0 }
   0xa   : > { %s2913_s27 = scalar_select %p26_p1, %s2832_s20, %s28_s25  }
   0xb   : > { %p37_p5 = por %p36_p2, %p35_p0  ;;  %p2915_p6 = por %p42_p4, %p41_p3 }
   0xc   : > { %p154_p7 = scmp.eq.s32.totalorder %s2897_s22, 1  ;;  %p160_p8 = scmp.eq.s32.totalorder %s2482_s23, 1 }
   0xd   : > { %p2682_p10 = scmp.lt.s32.totalorder %s2836_s21, 2  ;;  %s189_s6 = sand.u32 1, %s2832_s20  }
   0xe   : > { %p2922_p11 = por %p154_p7, %p35_p0  ;;  %p2926_p12 = por %p160_p8, %p41_p3 }
   0xf   : > { %s2546_s7 = sshll.u32 %s2836_s21, 7  ;;  %s2668_s8 = smul.u32 80, %s189_s6 }
  0x10   : > { %s3572_s29 = scalar_select %p2922_p11, 1, 0 }
  0x11   : > { %s3573_s30 = scalar_select %p2926_p12, 1, 0 }
  0x12   : > { %s2935_s11 = scalar_lea.hbm %s3564_s0, %s2546_s7  ;;  %p2937_p13 = pnand %p2682_p10, %p37_p5 }
  0x13   : > { %s193_s13 = scalar_lea.vmem [#allocation2], %s2668_s8  ;;  %s2944_s15 = scalar_lea.sflag [#allocation3], %s189_s6 }
  0x14   : > { %s200_s14 = sshll.u32 %s193_s13, 4  ;;  %s2740_s16 = scalar_lea.hbm %s2935_s11, 1280  ;;  %s2941_s14 = int_to_ptr.vmem [resolvable:$true] %s200_s14 }
  0x15   : > { %p2741_p1 = scmp.ne.s32.totalorder %s2935_s11, %s2740_s16  ;;  %p2742_p2 = pneg %p2937_p13 }
  0x16   : > { %s2745_s25 = scalar_lea.hbm %s3564_s0, 2560  ;;  %p2746_p5 = scmp.lt.u32.totalorder %s2935_s11, %s3564_s0 }
  0x17   : > { %p2743_p3 = pnand %p2742_p2, %p2741_p1  ;;  %p2747_p7 = scmp.lt.u32.totalorder %s2745_s25, %s2740_s16 }
  0x18   : > { %p2749_p10 = scmp.lt.u32.totalorder %s2740_s16, %s2935_s11 }
  0x19   : > { %p2744_p4 = pneg %p2743_p3  ;;  %p2748_p8 = por %p2747_p7, %p2746_p5 }
  0x1b   : > { %p2750_p9 = por %p2749_p10, %p2748_p8 }
  0x1d   : > { %p2751_p0 = pnand %p2750_p9, %p2744_p4 }
  0x1f   : > { %2754 = shalt.err (!%p2751_p0)
}
  0x20   : > { %s2755_s6 = scalar_lea.vmem %s2941_s14, 1280  ;;  %s2838_s8 = smov [#allocation2]  }
  0x21   : > { %p2756_p1 = scmp.ne.s32.totalorder %s2941_s14, %s2755_s6  ;;  %s2760_s9 = sshll.u32 %s2838_s8, 4  ;;  %s2761_s9 = int_to_ptr.vmem [resolvable:$false] %s2760_s9 }
  0x22   : > { %s2762_s10 = scalar_lea.vmem %s2761_s9, 2560  ;;  %p2763_p11 = scmp.lt.s32.totalorder %s2941_s14, %s2761_s9 }
  0x23   : > { %p2758_p3 = pnand %p2756_p1, %p2742_p2  ;;  %p2764_p5 = scmp.lt.s32.totalorder %s2762_s10, %s2755_s6 }
  0x25   : > { %p2759_p12 = pneg %p2758_p3  ;;  %p2765_p7 = por %p2764_p5, %p2763_p11 }
  0x27   : > { %p2766_p8 = pnand %p2765_p7, %p2759_p12 }
  0x29   : > { %2769 = shalt.err (!%p2766_p8)
}
  0x2a   : > { %s2839_s13 = smov 256   ;;  %s2840_s16 = smov 128  }
  0x2b   : > { %s2841_s17 = smov 8   ;;  %p216_p9 = scmp.lt.s32.totalorder %s2836_s21, 3 }
  0x2c   : > { %2677 = dma.hbm_to_vmem [thread:$0]  (!%p2937_p13), %s2935_s11, 1280, %s2941_s14, %s2944_s15, %s2839_s13, %s2840_s16, %s2841_s17  }
  0x2d   : > { %p3575_p0 = scmp.ge.s32.totalorder %s2836_s21, 1 }
  0x2f   : > { %p217_p2 = pnand %p3575_p0, %p216_p9 }
  0x30   : > { %s2976_s23 = sand.u32 (!%p217_p2), 1, %s2828_s19  }
  0x31   : > { %220 = sbr.rel (%p217_p2) target bundleno = 711 (0x2c7), region = 40  ;;  %s223_s26 = scalar_lea.sflag (!%p217_p2), [#allocation3], %s2976_s23 }
  0x32   : > { %s2669_s25 = smul.u32 (!%p217_p2), 80, %s2976_s23 }
  0x34   : > { %s2980_s7 = scalar_lea.vmem (!%p217_p2), [#allocation2], %s2669_s25 }
  0x38   : > { %2815 = dma.done.wait (%p2915_p6), %s223_s26, 1280  }
  0x39   : > { %2817 = vsyncadd (%p2915_p6), %s223_s26, 4294966016  ;;  %v2842_v0 = vmov 0.0   ;;  %v2843_v1 = vmov 0   ;;  %v264_v2 = vld [vmem:[%s2980_s7] sm:$0xff]  ;;  %v265_v3 = vld [vmem:[%s2980_s7 + $0x8] sm:$0xff]  ;;  %vm363_vm0 = vcmask 130048  }
  0x3a   : > { %440 = vmatprep.mubr.f32.mxu0 %v2842_v0  ;;  %529 = vmatprep.mubr.f32.mxu1 %v2842_v0  ;;  %v266_v4 = vld [vmem:[%s2980_s7 + $0x10] sm:$0xff]  ;;  %v267_v5 = vld [vmem:[%s2980_s7 + $0x18] sm:$0xff]  ;;  %v2992_v6 = vunpack.c.h.bf16 %v264_v2  ;;  %v2994_v7 = vunpack.c.h.bf16 %v265_v3  ;;  %v268_v9 = vld [vmem:[%s2980_s7 + $0x20] sm:$0xff]  ;;  %v3000_v11 = vunpack.c.l.bf16 %v264_v2  ;;  %v3008_v15 = vunpack.c.l.bf16 %v265_v3  ;;  %s2489_s14 = sshll.u32 %s2897_s22, 1  ;;  %s2488_s9 = sshll.u32 %s2976_s23, 1 }
  0x3b   : > { %2722 = vset.pattern.permute.xlu0 %v2843_v1  ;;  %2723 = vset.pattern.permute.xlu1 %v2843_v1  ;;  %v2996_v8 = vunpack.c.h.bf16 %v266_v4  ;;  %v269_v10 = vld [vmem:[%s2980_s7 + $0x28] sm:$0xff]  ;;  %v3002_v12 = vunpack.c.h.bf16 %v267_v5  ;;  %v3004_v13 = vunpack.c.h.bf16 %v268_v9  ;;  %v272_v16 = vld [vmem:[%s2980_s7 + $0x40] sm:$0xff]  ;;  %v3013_v18 = vunpack.c.l.bf16 %v266_v4  ;;  %v270_v58 = vld [vmem:[%s2980_s7 + $0x30] sm:$0xff]  ;;  %p259_p6 = scmp.lt.s32.totalorder %s2489_s14, 3  ;;  %s2547_s10 = sshll.u32 %s2897_s22, 5 }
  0x3c   : > { %v3006_v14 = vunpack.c.h.bf16 %v269_v10  ;;  %v3015_v19 = vunpack.c.l.bf16 %v267_v5  ;;  %v3017_v20 = vunpack.c.l.bf16 %v268_v9  ;;  %v3025_v24 = vunpack.c.l.bf16 %v269_v10  ;;  %v298_v25 = vld [vmem:[%s3567_s3] sm:$0xff]  ;;  %v273_v29 = vld [vmem:[%s2980_s7 + $0x48] sm:$0xff]  ;;  %v300_v31 = vld [vmem:[%s3567_s3 + $0x10] sm:$0xff]  ;;  %s256_s13 = scalar_lea.vmem [#allocation5], %s2488_s9  ;;  %s3520_s26 = scalar_lea.hbm %s3569_s5, %s2547_s10 }
  0x3d   : > { %v304_v17 = vmul.f32 %v2996_v8, %v2992_v6  ;;  %v306_v21 = vmul.f32 %v3002_v12, %v2994_v7  ;;  %v308_v22 = vmul.f32 %v3004_v13, %v2992_v6  ;;  %v303_v26 = vmul.f32 %v3013_v18, %v3000_v11  ;;  %345 = vperm.xlu0 %2722, %v298_v25   ;;  %v299_v36 = vld [vmem:[%s3567_s3 + $0x8] sm:$0xff]  ;;  %v301_v41 = vld [vmem:[%s3567_s3 + $0x18] sm:$0xff]  ;;  %v3059_v49 = vld [vmem:[%s3566_s2] sm:$0xff]  ;;  %s3584_s14 = smov (!%p259_p6, %s2489_s14), 3  ;;  %s2403_s16 = sshll.u32 %s256_s13, 4  ;;  %s3522_s16 = int_to_ptr.vmem [resolvable:$true] %s2403_s16 }
  0x3e   : > { %v310_v23 = vmul.f32 %v3006_v14, %v2994_v7  ;;  %v305_v27 = vmul.f32 %v3015_v19, %v3008_v15  ;;  %v307_v28 = vmul.f32 %v3017_v20, %v3000_v11  ;;  %v3037_v30 = vunpack.c.l.bf16 %v272_v16  ;;  %355 = vperm.xlu1 %2723, %v300_v31   ;;  %v271_v4 = vld [vmem:[%s2980_s7 + $0x38] sm:$0xff]  ;;  %s261_s8 = scalar_lea.vmem %s3565_s1, %s3584_s14  ;;  %s2389_s7 = scalar_lea.sflag [#allocation4], %s2976_s23 }
  0x3f   : > { %v2548_v32 = vpack.c.bf16 %v306_v21, %v304_v17  ;;  %v2067_v33 = vadd.f32 %v306_v21, %v304_v17  ;;  %v309_v39 = vmul.f32 %v3025_v24, %v3008_v15  ;;  %v3047_v40 = vunpack.c.h.bf16 %v272_v16  ;;  %v3081_v5 = vld [vmem:[%s3566_s2 + $0x8] sm:$0xff]  ;;  %s2770_s28 = scalar_lea.vmem %s3522_s16, 32  ;;  %p3576_p12 = scmp.ne.s32.totalorder %s3572_s29, 0 }
  0x40   : > { %v2552_v34 = vpack.c.bf16 %v310_v23, %v308_v22  ;;  %v2081_v35 = vadd.f32 %v310_v23, %v308_v22  ;;  %v2550_v37 = vpack.c.bf16 %v305_v27, %v303_v26  ;;  %v2060_v38 = vadd.f32 %v305_v27, %v303_v26  ;;  %p2771_p11 = scmp.ne.s32.totalorder %s3522_s16, %s2770_s28  ;;  %s2845_s22 = smov [#allocation5]  }
  0x41   : > { %2549 = vmatprep.subr.bf16.mxu0 %v2548_v32  ;;  %v2068_v42 = vrot.slane %v2067_v33, 4  ;;  %v3052_v44 = vunpack.c.l.bf16 %v273_v29  ;;  %v3054_v45 = vunpack.c.h.bf16 %v273_v29  ;;  %v2554_v47 = vpack.c.bf16 %v309_v39, %v307_v28  ;;  %350 = vperm.xlu0 %2722, %v299_v36   ;;  %v3102_v32 = vld [vmem:[%s3566_s2 + $0x10] sm:$0xff]  ;;  %s2774_s11 = sshll.u32 %s2845_s22, 4  ;;  %s2775_s11 = int_to_ptr.vmem [resolvable:$false] %s2774_s11 }
  0x42   : > { %2553 = vmatprep.subr.bf16.mxu1 %v2552_v34  ;;  %v2082_v43 = vrot.slane %v2081_v35, 4  ;;  %2551 = vmatpush1.bf16.msra.mxu0 %v2550_v37  ;;  %v2061_v46 = vrot.slane %v2060_v38, 4  ;;  %v2074_v48 = vadd.f32 %v309_v39, %v307_v28  ;;  %v316_v50 = vmul.f32 %v3047_v40, %v2992_v6  ;;  %p2772_p13 = pnand %p2771_p11, %p3576_p12  ;;  %s2776_s12 = scalar_lea.vmem %s2775_s11, 64 }
  0x43   : > { %v2069_v51 = vadd.f32 %v2068_v42, %v2067_v33  ;;  %v318_v53 = vmul.f32 %v3054_v45, %v2994_v7  ;;  %v315_v54 = vmul.f32 %v3037_v30, %v3000_v11  ;;  %360 = vperm.xlu1 %2723, %v301_v41   ;;  %2555 = vmatpush1.bf16.msra.mxu1 %v2554_v47  ;;  %v3085_v16 = vunpack.c.h.bf16 %v270_v58  ;;  %p2777_p10 = scmp.lt.s32.totalorder %s3522_s16, %s2775_s11  ;;  %p2778_p1 = scmp.lt.s32.totalorder %s2776_s12, %s2770_s28 }
  0x44   : > { %v2083_v52 = vadd.f32 %v2082_v43, %v2081_v35  ;;  %v2062_v55 = vadd.f32 %v2061_v46, %v2060_v38  ;;  %v2075_v56 = vrot.slane %v2074_v48, 4  ;;  %v317_v57 = vmul.f32 %v3052_v44, %v3008_v15  ;;  %p2773_p4 = pneg %p2772_p13 }
  0x45   : > { %v2070_v59 = vrot.slane %v2069_v51, 2  ;;  %2490 = vmatmul.mubr.msk.f32.vlgmr.msra.gmra.mrb[0].mxu0 %vm363_vm0, %v3059_v49  ;;  %v2560_v61 = vpack.c.bf16 %v318_v53, %v316_v50  ;;  %v3072_v62 = vadd.f32 %v318_v53, %v316_v50  ;;  %v3087_v22 = vunpack.c.l.bf16 %v270_v58  ;;  %p2779_p3 = por %p2778_p1, %p2777_p10 }
  0x46   : > { %v2084_v60 = vrot.slane %v2083_v52, 2  ;;  %v2063_v63 = vrot.slane %v2062_v55, 2  ;;  %v2076_v1 = vadd.f32 %v2075_v56, %v2074_v48  ;;  %v2562_v2 = vpack.c.bf16 %v317_v57, %v315_v54  ;;  %446 = vmatprep.mubr.f32.mxu0 %v2842_v0  ;;  %2494 = vmatmul.mubr.msk.f32.vlgmr.msra.gmra.mrb[0].mxu1 %vm363_vm0, %v3059_v49 }
  0x47   : > { %v3074_v3 = vadd.f32 %v317_v57, %v315_v54  ;;  %v2071_v9 = vadd.f32 %v2070_v59, %v2069_v51  ;;  %2561 = vmatprep.subr.bf16.mxu1 %v2560_v61  ;;  %535 = vmatprep.mubr.f32.mxu1 %v2842_v0  ;;  %v3090_v26 = vunpack.c.h.bf16 %v271_v4  ;;  %v3094_v29 = vunpack.c.l.bf16 %v271_v4  ;;  %p2780_p5 = pnand %p2779_p3, %p2773_p4 }
  0x48   : > { %v2085_v10 = vadd.f32 %v2084_v60, %v2083_v52  ;;  %v2064_v17 = vadd.f32 %v2063_v63, %v2062_v55  ;;  %v2077_v21 = vrot.slane %v2076_v1, 2  ;;  %2563 = vmatpush1.bf16.msra.mxu1 %v2562_v2  ;;  %v312_v31 = vmul.f32 %v3085_v16, %v2992_v6 }
  0x49   : > { %v2072_v23 = vrot.slane %v2071_v9, 1  ;;  %2491 = vmatmul.mubr.msk.f32.gmra.mrb[2].mxu0 %vm363_vm0, %v3081_v5  ;;  %v314_v35 = vmul.f32 %v3090_v26, %v2994_v7  ;;  %vm2248_vm1 = vcmask 1040384   ;;  %v311_v6 = vmul.f32 %v3087_v22, %v3000_v11  ;;  %v3124_v11 = vld [vmem:[%s3566_s2 + $0x18] sm:$0xff] }
  0x4a   : > { %v2086_v25 = vrot.slane %v2085_v10, 1  ;;  %v2065_v27 = vrot.slane %v2064_v17, 1  ;;  %v2078_v28 = vadd.f32 %v2077_v21, %v2076_v1  ;;  %452 = vmatprep.mubr.f32.mxu0 %v2842_v0  ;;  %2495 = vmatmul.mubr.msk.f32.gmra.mrb[2].mxu1 %vm363_vm0, %v3081_v5  ;;  %v313_v42 = vmul.f32 %v3094_v29, %v3008_v15 }
  0x4b   : > { %v2073_v33 = vadd.f32 %v2072_v23, %v2071_v9  ;;  %541 = vmatprep.mubr.f32.mxu1 %v2842_v0  ;;  %v2556_v39 = vpack.c.bf16 %v314_v35, %v312_v31  ;;  %v3114_v41 = vadd.f32 %v314_v35, %v312_v31  ;;  %v324_v43 = vmul.f32 %v3085_v16, %v2996_v8 }
  0x4c   : > { %v2087_v34 = vadd.f32 %v2086_v25, %v2085_v10  ;;  %v2066_v36 = vadd.f32 %v2065_v27, %v2064_v17  ;;  %v2079_v37 = vrot.slane %v2078_v28, 1  ;;  %v326_v46 = vmul.f32 %v3090_v26, %v3002_v12 }
  0x4d   : > { %2492 = vmatmul.mubr.msk.f32.gmra.mrb[4].mxu0 %vm363_vm0, %v3102_v32  ;;  %2557 = vmatprep.subr.bf16.mxu0 %v2556_v39  ;;  %v2558_v15 = vpack.c.bf16 %v313_v42, %v311_v6  ;;  %v3135_v48 = vadd.f32 %v313_v42, %v311_v6  ;;  %v323_v50 = vmul.f32 %v3087_v22, %v3013_v18  ;;  %vm1346_vm2 = vcmask 261120  }
  0x4e   : > { %v3112_v38 = vsel %vm2248_vm1, %v2073_v33, %v2087_v34  ;;  %v2080_v7 = vadd.f32 %v2079_v37, %v2078_v28  ;;  %458 = vmatprep.mubr.f32.mxu0 %v2842_v0  ;;  %2496 = vmatmul.mubr.msk.f32.gmra.mrb[4].mxu1 %vm363_vm0, %v3102_v32  ;;  %v2568_v51 = vpack.c.bf16 %v326_v46, %v324_v43  ;;  %vm2251_vm3 = vcmask 1041408  }
  0x4f   : > { %547 = vmatprep.mubr.f32.mxu1 %v2842_v0  ;;  %v3142_v52 = vadd.f32 %v326_v46, %v324_v43  ;;  %2559 = vmatpush1.bf16.msra.mxu0 %v2558_v15  ;;  %v325_v53 = vmul.f32 %v3094_v29, %v3015_v19  ;;  %v320_v54 = vmul.f32 %v3004_v13, %v2996_v8  ;;  %vm2254_vm4 = vcmask 1042432  }
  0x50   : > { %v3133_v47 = vsel %vm2248_vm1, %v2066_v36, %v2080_v7  ;;  %v322_v55 = vmul.f32 %v3006_v14, %v3002_v12  ;;  %2569 = vmatprep.subr.bf16.mxu1 %v2568_v51  ;;  %v319_v56 = vmul.f32 %v3017_v20, %v3013_v18  ;;  %v321_v57 = vmul.f32 %v3025_v24, %v3015_v19 }
  0x51   : > { %2493 = vmatmul.mubr.msk.f32.gmra.mrb[6].mxu0 %vm363_vm0, %v3124_v11  ;;  %v2570_v58 = vpack.c.bf16 %v325_v53, %v323_v50  ;;  %v3158_v59 = vadd.f32 %v325_v53, %v323_v50  ;;  %v332_v2 = vmul.f32 %v3085_v16, %v3004_v13  ;;  %v334_v4 = vmul.f32 %v3090_v26, %v3006_v14 }
  0x52   : > { %618 = vmatprep.mubr.f32.mxu0 %v2842_v0  ;;  %2497 = vmatmul.mubr.msk.f32.gmra.mrb[6].mxu1 %vm363_vm0, %v3124_v11  ;;  %v2564_v60 = vpack.c.bf16 %v322_v55, %v320_v54  ;;  %v3162_v61 = vadd.f32 %v322_v55, %v320_v54  ;;  %v2566_v63 = vpack.c.bf16 %v321_v57, %v319_v56  ;;  %vm2257_vm5 = vcmask 1043456  }
  0x53   : > { %707 = vmatprep.mubr.f32.mxu1 %v2842_v0  ;;  %v3165_v1 = vadd.f32 %v321_v57, %v319_v56  ;;  %v2576_v9 = vpack.c.bf16 %v334_v4, %v332_v2  ;;  %v3177_v10 = vadd.f32 %v334_v4, %v332_v2  ;;  %v331_v17 = vmul.f32 %v3087_v22, %v3017_v20 }
  0x54   : > { %2565 = vmatprep.subr.bf16.mxu0 %v2564_v60  ;;  %v333_v21 = vmul.f32 %v3094_v29, %v3025_v24  ;;  %v328_v23 = vmul.f32 %v3047_v40, %v2996_v8  ;;  %v330_v27 = vmul.f32 %v3054_v45, %v3002_v12  ;;  %v327_v28 = vmul.f32 %v3037_v30, %v3013_v18 }
  0x55   : > { %2498 = vmatmul.mubr.msk.f32.vlgmr.msra.gmra.mrb[8].mxu0 %vm363_vm0, %v3059_v49  ;;  %v329_v31 = vmul.f32 %v3052_v44, %v3015_v19  ;;  %v340_v18 = vmul.f32 %v3047_v40, %v3085_v16  ;;  %v342_v19 = vmul.f32 %v3054_v45, %v3090_v26  ;;  %v339_v35 = vmul.f32 %v3037_v30, %v3087_v22 }
  0x56   : > { %624 = vmatprep.mubr.f32.mxu0 %v2842_v0  ;;  %2502 = vmatmul.mubr.msk.f32.vlgmr.msra.gmra.mrb[8].mxu1 %vm363_vm0, %v3059_v49  ;;  %v3190_v25 = vadd.f32 %v333_v21, %v331_v17  ;;  %v2572_v8 = vpack.c.bf16 %v330_v27, %v328_v23  ;;  %v3202_v33 = vadd.f32 %v330_v27, %v328_v23  ;;  %vm2260_vm6 = vcmask 1044480  }
  0x57   : > { %2567 = vmatpush1.bf16.msra.mxu0 %v2566_v63  ;;  %2571 = vmatpush1.bf16.msra.mxu1 %v2570_v58  ;;  %v3206_v34 = vadd.f32 %v329_v31, %v327_v28  ;;  %v2574_v12 = vpack.c.bf16 %v329_v31, %v327_v28  ;;  %v341_v36 = vmul.f32 %v3052_v44, %v3094_v29  ;;  %vm2263_vm7 = vcmask 1045504  }
  0x58   : > { %713 = vmatprep.mubr.f32.mxu1 %v2842_v0  ;;  %2577 = vmatprep.subr.bf16.mxu1 %v2576_v9  ;;  %v2578_v37 = vpack.c.bf16 %v333_v21, %v331_v17  ;;  %v3220_v6 = vadd.f32 %v342_v19, %v340_v18  ;;  %v2584_v16 = vpack.c.bf16 %v342_v19, %v340_v18  ;;  %vm2266_vm8 = vcmask 1046528  }
  0x59   : > { %2499 = vmatmul.mubr.msk.f32.gmra.mrb[10].mxu0 %vm363_vm0, %v3081_v5  ;;  %2573 = vmatprep.subr.bf16.mxu0 %v2572_v8  ;;  %v3224_v39 = vadd.f32 %v341_v36, %v339_v35  ;;  %v336_v22 = vmul.f32 %v3047_v40, %v3004_v13  ;;  %v338_v26 = vmul.f32 %v3054_v45, %v3006_v14 }
  0x5a   : > { %630 = vmatprep.mubr.f32.mxu0 %v2842_v0  ;;  %2503 = vmatmul.mubr.msk.f32.gmra.mrb[10].mxu1 %vm363_vm0, %v3081_v5  ;;  %v335_v13 = vmul.f32 %v3037_v30, %v3017_v20  ;;  %v337_v14 = vmul.f32 %v3052_v44, %v3025_v24  ;;  %v2586_v24 = vpack.c.bf16 %v341_v36, %v339_v35 }
  0x5b   : > { %719 = vmatprep.mubr.f32.mxu1 %v2842_v0  ;;  %v2580_v29 = vpack.c.bf16 %v338_v26, %v336_v22  ;;  %v3237_v7 = vadd.f32 %v338_v26, %v336_v22 }
  0x5c   : > { %v3248_v40 = vadd.f32 %v337_v14, %v335_v13  ;;  %v2582_v20 = vpack.c.bf16 %v337_v14, %v335_v13 }
  0x5d   : > { %2500 = vmatmul.mubr.msk.f32.gmra.mrb[12].mxu0 %vm363_vm0, %v3102_v32 }
  0x5e   : > { %636 = vmatprep.mubr.f32.mxu0 %v2842_v0  ;;  %2504 = vmatmul.mubr.msk.f32.gmra.mrb[12].mxu1 %vm363_vm0, %v3102_v32 }
  0x5f   : > { %725 = vmatprep.mubr.f32.mxu1 %v2842_v0 }
  0x61   : > { %2501 = vmatmul.mubr.msk.f32.gmra.mrb[14].mxu0 %vm363_vm0, %v3124_v11 }
  0x62   : > { %796 = vmatprep.mubr.f32.mxu0 %v2842_v0  ;;  %2505 = vmatmul.mubr.msk.f32.gmra.mrb[14].mxu1 %vm363_vm0, %v3124_v11 }
  0x63   : > { %885 = vmatprep.mubr.f32.mxu1 %v2842_v0 }
  0x65   : > { %2506 = vmatmul.mubr.msk.f32.vlgmr.msra.gmra.mrb[16].mxu0 %vm363_vm0, %v3059_v49 }
  0x66   : > { %802 = vmatprep.mubr.f32.mxu0 %v2842_v0  ;;  %2575 = vmatpush1.bf16.msra.mxu0 %v2574_v12 }
  0x67   : > { %2510 = vmatmul.mubr.msk.f32.vlgmr.msra.gmra.mrb[16].mxu1 %vm363_vm0, %v3059_v49  ;;  %2581 = vmatprep.subr.bf16.mxu0 %v2580_v29 }
  0x68   : > { %2579 = vmatpush1.bf16.msra.mxu1 %v2578_v37  ;;  %891 = vmatprep.mubr.f32.mxu1 %v2842_v0 }
  0x69   : > { %2507 = vmatmul.mubr.msk.f32.gmra.mrb[18].mxu0 %vm363_vm0, %v3081_v5  ;;  %2585 = vmatprep.subr.bf16.mxu1 %v2584_v16 }
  0x6a   : > { %808 = vmatprep.mubr.f32.mxu0 %v2842_v0 }
  0x6b   : > { %2511 = vmatmul.mubr.msk.f32.gmra.mrb[18].mxu1 %vm363_vm0, %v3081_v5 }
  0x6c   : > { %897 = vmatprep.mubr.f32.mxu1 %v2842_v0 }
  0x6d   : > { %2508 = vmatmul.mubr.msk.f32.gmra.mrb[20].mxu0 %vm363_vm0, %v3102_v32 }
  0x6e   : > { %814 = vmatprep.mubr.f32.mxu0 %v2842_v0 }
  0x6f   : > { %2512 = vmatmul.mubr.msk.f32.gmra.mrb[20].mxu1 %vm363_vm0, %v3102_v32 }
  0x70   : > { %903 = vmatprep.mubr.f32.mxu1 %v2842_v0 }
  0x71   : > { %2509 = vmatmul.mubr.msk.f32.gmra.mrb[22].mxu0 %vm363_vm0, %v3124_v11 }
  0x72   : > { %974 = vmatprep.mubr.f32.mxu0 %v2842_v0 }
  0x73   : > { %2513 = vmatmul.mubr.msk.f32.gmra.mrb[22].mxu1 %vm363_vm0, %v3124_v11 }
  0x74   : > { %1063 = vmatprep.mubr.f32.mxu1 %v2842_v0 }
  0x75   : > { %2514 = vmatmul.mubr.msk.f32.vlgmr.msra.gmra.mrb[24].mxu0 %vm363_vm0, %v3059_v49 }
  0x76   : > { %980 = vmatprep.mubr.f32.mxu0 %v2842_v0  ;;  %2583 = vmatpush1.bf16.msra.mxu0 %v2582_v20 }
  0x77   : > { %2518 = vmatmul.mubr.msk.f32.vlgmr.msra.gmra.mrb[24].mxu1 %vm363_vm0, %v3059_v49 }
  0x78   : > { %2587 = vmatpush1.bf16.msra.mxu1 %v2586_v24  ;;  %1069 = vmatprep.mubr.f32.mxu1 %v2842_v0 }
  0x79   : > { %2515 = vmatmul.mubr.msk.f32.gmra.mrb[26].mxu0 %vm363_vm0, %v3081_v5 }
  0x7a   : > { %986 = vmatprep.mubr.f32.mxu0 %v2842_v0 }
  0x7b   : > { %2519 = vmatmul.mubr.msk.f32.gmra.mrb[26].mxu1 %vm363_vm0, %v3081_v5 }
  0x7c   : > { %1075 = vmatprep.mubr.f32.mxu1 %v2842_v0 }
  0x7d   : > { %2516 = vmatmul.mubr.msk.f32.gmra.mrb[28].mxu0 %vm363_vm0, %v3102_v32 }
  0x7e   : > { %992 = vmatprep.mubr.f32.mxu0 %v2842_v0 }
  0x7f   : > { %2520 = vmatmul.mubr.msk.f32.gmra.mrb[28].mxu1 %vm363_vm0, %v3102_v32 }
  0x80   : > { %1081 = vmatprep.mubr.f32.mxu1 %v2842_v0 }
  0x81   : > { %2517 = vmatmul.mubr.msk.f32.gmra.mrb[30].mxu0 %vm363_vm0, %v3124_v11 }
  0x82   : > { %1152 = vmatprep.mubr.f32.mxu0 %v2842_v0 }
  0x83   : > { %2521 = vmatmul.mubr.msk.f32.gmra.mrb[30].mxu1 %vm363_vm0, %v3124_v11 }
  0x84   : > { %1241 = vmatprep.mubr.f32.mxu1 %v2842_v0 }
  0x85   : > { %2522 = vmatmul.mubr.msk.f32.vlgmr.msra.gmra.mrb[32].mxu0 %vm363_vm0, %v3059_v49 }
  0x86   : > { %1158 = vmatprep.mubr.f32.mxu0 %v2842_v0 }
  0x87   : > { %2526 = vmatmul.mubr.msk.f32.vlgmr.msra.gmra.mrb[32].mxu1 %vm363_vm0, %v3059_v49 }
  0x88   : > { %1247 = vmatprep.mubr.f32.mxu1 %v2842_v0 }
  0x89   : > { %2523 = vmatmul.mubr.msk.f32.gmra.mrb[34].mxu0 %vm363_vm0, %v3081_v5 }
  0x8a   : > { %1164 = vmatprep.mubr.f32.mxu0 %v2842_v0 }
  0x8b   : > { %2527 = vmatmul.mubr.msk.f32.gmra.mrb[34].mxu1 %vm363_vm0, %v3081_v5 }
  0x8c   : > { %1253 = vmatprep.mubr.f32.mxu1 %v2842_v0 }
  0x8d   : > { %2524 = vmatmul.mubr.msk.f32.gmra.mrb[36].mxu0 %vm363_vm0, %v3102_v32 }
  0x8e   : > { %1170 = vmatprep.mubr.f32.mxu0 %v2842_v0 }
  0x8f   : > { %2528 = vmatmul.mubr.msk.f32.gmra.mrb[36].mxu1 %vm363_vm0, %v3102_v32 }
  0x90   : > { %1259 = vmatprep.mubr.f32.mxu1 %v2842_v0 }
  0x91   : > { %2525 = vmatmul.mubr.msk.f32.gmra.mrb[38].mxu0 %vm363_vm0, %v3124_v11 }
  0x92   : > { %1414 = vmatprep.mubr.f32.mxu0 %v2842_v0 }
  0x93   : > { %2529 = vmatmul.mubr.msk.f32.gmra.mrb[38].mxu1 %vm363_vm0, %v3124_v11 }
  0x94   : > { %1485 = vmatprep.mubr.f32.mxu1 %v2842_v0 }
  0xbc   : > { %v3308_v30 = vpop.permute.xlu0 %345 }
  0xbd   : > { %v3314_v15 = vpop.permute.xlu1 %355 }
  0xc0   : > { %v3310_v5 = vpop.permute.xlu0 %350 }
  0xc2   : > { %v3322_v18 = vpop.permute.xlu1 %360 }
 0x118   : > { %v442_v44 = vpop.f32.mrb[0].mxu0 }
 0x119   : > { %v444_v45 = vpop.f32.mrb[1].mxu0  ;;  %v531_v49 = vpop.f32.mrb[0].mxu1  ;;  %v443_v42 = vadd.f32 %v442_v44, %v3308_v30 }
 0x11a   : > { %v533_v32 = vpop.f32.mrb[1].mxu1  ;;  %v445_v43 = vadd.f32 %v444_v45, %v3308_v30  ;;  %v532_v50 = vadd.f32 %v531_v49, %v3308_v30 }
 0x11b   : > { %v534_v53 = vadd.f32 %v533_v32, %v3308_v30  ;;  %v1266_v56 = vmax.f32 %v443_v42, 0.0 }
 0x11c   : > { %v448_v46 = vpop.f32.mrb[2].mxu0  ;;  %v1267_v63 = vmax.f32 %v445_v43, 0.0  ;;  %v1268_v17 = vmax.f32 %v532_v50, 0.0 }
 0x11d   : > { %v449_v11 = vadd.f32 %v448_v46, %v3310_v5  ;;  %v450_v51 = vpop.f32.mrb[3].mxu0  ;;  %v537_v54 = vpop.f32.mrb[2].mxu1  ;;  %v1269_v28 = vmax.f32 %v534_v53, 0.0 }
 0x11e   : > { %v451_v55 = vadd.f32 %v450_v51, %v3310_v5  ;;  %v538_v58 = vadd.f32 %v537_v54, %v3310_v5  ;;  %v539_v60 = vpop.f32.mrb[3].mxu1 }
 0x11f   : > { %v1286_v57 = vmax.f32 %v449_v11, 0.0  ;;  %v540_v4 = vadd.f32 %v539_v60, %v3310_v5 }
 0x120   : > { %v1287_v2 = vmax.f32 %v451_v55, 0.0  ;;  %v454_v9 = vpop.f32.mrb[4].mxu0  ;;  %v1288_v23 = vmax.f32 %v538_v58, 0.0 }
 0x121   : > { %v2590_v21 = vpack.c.bf16 %v1286_v57, %v1266_v56  ;;  %v456_v27 = vpop.f32.mrb[5].mxu0  ;;  %v1289_v8 = vmax.f32 %v540_v4, 0.0  ;;  %v543_v12 = vpop.f32.mrb[4].mxu1  ;;  %v455_v36 = vadd.f32 %v454_v9, %v3314_v15 }
 0x122   : > { %v2588_v31 = vpack.c.bf16 %v1287_v2, %v1267_v63  ;;  %v2598_v19 = vpack.c.bf16 %v1288_v23, %v1268_v17  ;;  %v545_v35 = vpop.f32.mrb[5].mxu1  ;;  %v457_v16 = vadd.f32 %v456_v27, %v3314_v15  ;;  %v544_v26 = vadd.f32 %v543_v12, %v3314_v15 }
 0x123   : > { %v2596_v37 = vpack.c.bf16 %v1289_v8, %v1269_v28  ;;  %v546_v14 = vadd.f32 %v545_v35, %v3314_v15  ;;  %v1306_v44 = vmax.f32 %v455_v36, 0.0  ;;  %v3339_v28 = vld [vmem:[%s3568_s4] sm:$0x1] }
 0x124   : > { %v460_v22 = vpop.f32.mrb[6].mxu0  ;;  %2589 = vmatprep.subr.bf16.mxu0 %v2588_v31  ;;  %v1307_v42 = vmax.f32 %v457_v16, 0.0  ;;  %v1308_v11 = vmax.f32 %v544_v26, 0.0 }
 0x125   : > { %v461_v29 = vadd.f32 %v460_v22, %v3322_v18  ;;  %v462_v13 = vpop.f32.mrb[7].mxu0  ;;  %2591 = vmatpush1.bf16.msra.mxu0 %v2590_v21  ;;  %v549_v20 = vpop.f32.mrb[6].mxu1  ;;  %2597 = vmatprep.subr.bf16.mxu1 %v2596_v37  ;;  %v1309_v55 = vmax.f32 %v546_v14, 0.0 }
 0x126   : > { %v463_v24 = vadd.f32 %v462_v13, %v3322_v18  ;;  %v550_v49 = vadd.f32 %v549_v20, %v3322_v18  ;;  %v551_v32 = vpop.f32.mrb[7].mxu1  ;;  %2599 = vmatpush1.bf16.msra.mxu1 %v2598_v19 }
 0x127   : > { %v1326_v45 = vmax.f32 %v461_v29, 0.0  ;;  %v552_v46 = vadd.f32 %v551_v32, %v3322_v18 }
 0x128   : > { %v1327_v43 = vmax.f32 %v463_v24, 0.0  ;;  %v620_v50 = vpop.f32.mrb[8].mxu0  ;;  %v1328_v53 = vmax.f32 %v550_v49, 0.0 }
 0x129   : > { %v2594_v51 = vpack.c.bf16 %v1326_v45, %v1306_v44  ;;  %v622_v54 = vpop.f32.mrb[9].mxu0  ;;  %v1329_v57 = vmax.f32 %v552_v46, 0.0  ;;  %v709_v58 = vpop.f32.mrb[8].mxu1  ;;  %v621_v2 = vadd.f32 %v620_v50, %v3308_v30 }
 0x12a   : > { %v2592_v56 = vpack.c.bf16 %v1327_v43, %v1307_v42  ;;  %v2602_v60 = vpack.c.bf16 %v1328_v53, %v1308_v11  ;;  %v711_v63 = vpop.f32.mrb[9].mxu1  ;;  %v623_v9 = vadd.f32 %v622_v54, %v3308_v30  ;;  %v710_v21 = vadd.f32 %v709_v58, %v3308_v30 }
 0x12b   : > { %v2600_v4 = vpack.c.bf16 %v1329_v57, %v1309_v55  ;;  %v712_v31 = vadd.f32 %v711_v63, %v3308_v30  ;;  %v1270_v19 = vmax.f32 %v621_v2, 0.0 }
 0x12c   : > { %v626_v17 = vpop.f32.mrb[10].mxu0  ;;  %2593 = vmatprep.subr.bf16.mxu0 %v2592_v56  ;;  %v1271_v16 = vmax.f32 %v623_v9, 0.0  ;;  %v1272_v13 = vmax.f32 %v710_v21, 0.0 }
 0x12d   : > { %v627_v23 = vadd.f32 %v626_v17, %v3310_v5  ;;  %v628_v27 = vpop.f32.mrb[11].mxu0  ;;  %2595 = vmatpush1.bf16.msra.mxu0 %v2594_v51  ;;  %v715_v8 = vpop.f32.mrb[10].mxu1  ;;  %2601 = vmatprep.subr.bf16.mxu1 %v2600_v4  ;;  %v1273_v44 = vmax.f32 %v712_v31, 0.0 }
 0x12e   : > { %v629_v12 = vadd.f32 %v628_v27, %v3310_v5  ;;  %v716_v36 = vadd.f32 %v715_v8, %v3310_v5  ;;  %v717_v37 = vpop.f32.mrb[11].mxu1  ;;  %2603 = vmatpush1.bf16.msra.mxu1 %v2602_v60 }
 0x12f   : > { %v1290_v35 = vmax.f32 %v627_v23, 0.0  ;;  %v718_v26 = vadd.f32 %v717_v37, %v3310_v5 }
 0x130   : > { %v1291_v22 = vmax.f32 %v629_v12, 0.0  ;;  %v632_v29 = vpop.f32.mrb[12].mxu0  ;;  %2530 = vmatmul.mubr.msk.f32.vlgmr.msra.gmra.mrb[40].mxu0 %vm1346_vm2, %v3339_v28  ;;  %v1292_v20 = vmax.f32 %v716_v36, 0.0 }
 0x131   : > { %v2606_v14 = vpack.c.bf16 %v1290_v35, %v1270_v19  ;;  %v634_v24 = vpop.f32.mrb[13].mxu0  ;;  %1556 = vmatprep.mubr.f32.mxu0 %v2842_v0  ;;  %v1293_v49 = vmax.f32 %v718_v26, 0.0  ;;  %v721_v32 = vpop.f32.mrb[12].mxu1  ;;  %2531 = vmatmul.mubr.msk.f32.vlgmr.msra.gmra.mrb[40].mxu1 %vm1346_vm2, %v3339_v28  ;;  %v633_v46 = vadd.f32 %v632_v29, %v3314_v15 }
 0x132   : > { %v2604_v45 = vpack.c.bf16 %v1291_v22, %v1271_v16  ;;  %v2614_v42 = vpack.c.bf16 %v1292_v20, %v1272_v13  ;;  %v723_v43 = vpop.f32.mrb[13].mxu1  ;;  %1627 = vmatprep.mubr.f32.mxu1 %v2842_v0  ;;  %v635_v11 = vadd.f32 %v634_v24, %v3314_v15  ;;  %v722_v53 = vadd.f32 %v721_v32, %v3314_v15 }
 0x133   : > { %v2612_v50 = vpack.c.bf16 %v1293_v49, %v1273_v44  ;;  %v724_v56 = vadd.f32 %v723_v43, %v3314_v15  ;;  %v1310_v60 = vmax.f32 %v633_v46, 0.0 }
 0x134   : > { %v638_v51 = vpop.f32.mrb[14].mxu0  ;;  %2605 = vmatprep.subr.bf16.mxu0 %v2604_v45  ;;  %v1311_v9 = vmax.f32 %v635_v11, 0.0  ;;  %v1312_v27 = vmax.f32 %v722_v53, 0.0 }
 0x135   : > { %v639_v54 = vadd.f32 %v638_v51, %v3322_v18  ;;  %v640_v55 = vpop.f32.mrb[15].mxu0  ;;  %2607 = vmatpush1.bf16.msra.mxu0 %v2606_v14  ;;  %v727_v57 = vpop.f32.mrb[14].mxu1  ;;  %2613 = vmatprep.subr.bf16.mxu1 %v2612_v50  ;;  %v1313_v19 = vmax.f32 %v724_v56, 0.0 }
 0x136   : > { %v641_v58 = vadd.f32 %v640_v55, %v3322_v18  ;;  %v728_v2 = vadd.f32 %v727_v57, %v3322_v18  ;;  %v729_v4 = vpop.f32.mrb[15].mxu1  ;;  %2615 = vmatpush1.bf16.msra.mxu1 %v2614_v42 }
 0x137   : > { %v1330_v63 = vmax.f32 %v639_v54, 0.0  ;;  %v730_v21 = vadd.f32 %v729_v4, %v3322_v18 }
 0x138   : > { %v1331_v17 = vmax.f32 %v641_v58, 0.0  ;;  %v798_v23 = vpop.f32.mrb[16].mxu0  ;;  %v1332_v8 = vmax.f32 %v728_v2, 0.0 }
 0x139   : > { %v2610_v31 = vpack.c.bf16 %v1330_v63, %v1310_v60  ;;  %v800_v12 = vpop.f32.mrb[17].mxu0  ;;  %v1333_v36 = vmax.f32 %v730_v21, 0.0  ;;  %v799_v22 = vadd.f32 %v798_v23, %v3308_v30 }
 0x13a   : > { %v2608_v35 = vpack.c.bf16 %v1331_v17, %v1311_v9  ;;  %v887_v37 = vpop.f32.mrb[16].mxu1  ;;  %v2618_v16 = vpack.c.bf16 %v1332_v8, %v1312_v27  ;;  %v801_v13 = vadd.f32 %v800_v12, %v3308_v30 }
 0x13b   : > { %v889_v26 = vpop.f32.mrb[17].mxu1  ;;  %v2616_v29 = vpack.c.bf16 %v1333_v36, %v1313_v19  ;;  %v888_v20 = vadd.f32 %v887_v37, %v3308_v30  ;;  %v1274_v42 = vmax.f32 %v799_v22, 0.0 }
 0x13c   : > { %v804_v14 = vpop.f32.mrb[18].mxu0  ;;  %2609 = vmatprep.subr.bf16.mxu0 %v2608_v35  ;;  %v890_v45 = vadd.f32 %v889_v26, %v3308_v30  ;;  %v1275_v11 = vmax.f32 %v801_v13, 0.0 }
 0x13d   : > { %v805_v24 = vadd.f32 %v804_v14, %v3310_v5  ;;  %v806_v44 = vpop.f32.mrb[19].mxu0  ;;  %2611 = vmatpush1.bf16.msra.mxu0 %v2610_v31  ;;  %2617 = vmatprep.subr.bf16.mxu1 %v2616_v29  ;;  %v1276_v55 = vmax.f32 %v888_v20, 0.0 }
 0x13e   : > { %v893_v49 = vpop.f32.mrb[18].mxu1  ;;  %v807_v32 = vadd.f32 %v806_v44, %v3310_v5  ;;  %2619 = vmatpush1.bf16.msra.mxu1 %v2618_v16  ;;  %v1277_v60 = vmax.f32 %v890_v45, 0.0 }
 0x13f   : > { %v1294_v43 = vmax.f32 %v805_v24, 0.0  ;;  %v894_v46 = vadd.f32 %v893_v49, %v3310_v5  ;;  %v895_v50 = vpop.f32.mrb[19].mxu1 }
 0x140   : > { %v1295_v51 = vmax.f32 %v807_v32, 0.0  ;;  %v896_v53 = vadd.f32 %v895_v50, %v3310_v5  ;;  %v810_v54 = vpop.f32.mrb[20].mxu0  ;;  %2532 = vmatmul.mubr.msk.f32.vlgmr.msra.gmra.mrb[42].mxu0 %vm1346_vm2, %v3339_v28 }
 0x141   : > { %v2622_v56 = vpack.c.bf16 %v1294_v43, %v1274_v42  ;;  %v1296_v57 = vmax.f32 %v894_v46, 0.0  ;;  %v812_v58 = vpop.f32.mrb[21].mxu0  ;;  %1698 = vmatprep.mubr.f32.mxu0 %v2842_v0  ;;  %2533 = vmatmul.mubr.msk.f32.vlgmr.msra.gmra.mrb[42].mxu1 %vm1346_vm2, %v3339_v28  ;;  %v811_v17 = vadd.f32 %v810_v54, %v3314_v15 }
 0x142   : > { %v2620_v63 = vpack.c.bf16 %v1295_v51, %v1275_v11  ;;  %v1297_v2 = vmax.f32 %v896_v53, 0.0  ;;  %v899_v4 = vpop.f32.mrb[20].mxu1  ;;  %1769 = vmatprep.mubr.f32.mxu1 %v2842_v0  ;;  %v813_v27 = vadd.f32 %v812_v58, %v3314_v15 }
 0x143   : > { %v2630_v9 = vpack.c.bf16 %v1296_v57, %v1276_v55  ;;  %v901_v21 = vpop.f32.mrb[21].mxu1  ;;  %v900_v8 = vadd.f32 %v899_v4, %v3314_v15  ;;  %v1314_v16 = vmax.f32 %v811_v17, 0.0 }
 0x144   : > { %v2628_v23 = vpack.c.bf16 %v1297_v2, %v1277_v60  ;;  %v816_v31 = vpop.f32.mrb[22].mxu0  ;;  %2621 = vmatprep.subr.bf16.mxu0 %v2620_v63  ;;  %v902_v35 = vadd.f32 %v901_v21, %v3314_v15  ;;  %v1315_v13 = vmax.f32 %v813_v27, 0.0 }
 0x145   : > { %v817_v12 = vadd.f32 %v816_v31, %v3322_v18  ;;  %v818_v19 = vpop.f32.mrb[23].mxu0  ;;  %2623 = vmatpush1.bf16.msra.mxu0 %v2622_v56  ;;  %v1316_v44 = vmax.f32 %v900_v8, 0.0 }
 0x146   : > { %v905_v36 = vpop.f32.mrb[22].mxu1  ;;  %2629 = vmatprep.subr.bf16.mxu1 %v2628_v23  ;;  %v819_v37 = vadd.f32 %v818_v19, %v3322_v18  ;;  %v1317_v42 = vmax.f32 %v902_v35, 0.0 }
 0x147   : > { %v1334_v22 = vmax.f32 %v817_v12, 0.0  ;;  %v906_v26 = vadd.f32 %v905_v36, %v3322_v18  ;;  %v907_v29 = vpop.f32.mrb[23].mxu1  ;;  %2631 = vmatpush1.bf16.msra.mxu1 %v2630_v9 }
 0x148   : > { %v1335_v14 = vmax.f32 %v819_v37, 0.0  ;;  %v908_v20 = vadd.f32 %v907_v29, %v3322_v18  ;;  %v976_v24 = vpop.f32.mrb[24].mxu0 }
 0x149   : > { %v2626_v45 = vpack.c.bf16 %v1334_v22, %v1314_v16  ;;  %v1336_v49 = vmax.f32 %v906_v26, 0.0  ;;  %v978_v32 = vpop.f32.mrb[25].mxu0  ;;  %v977_v51 = vadd.f32 %v976_v24, %v3308_v30 }
 0x14a   : > { %v2624_v43 = vpack.c.bf16 %v1335_v14, %v1315_v13  ;;  %v1337_v46 = vmax.f32 %v908_v20, 0.0  ;;  %v1065_v50 = vpop.f32.mrb[24].mxu1  ;;  %v979_v55 = vadd.f32 %v978_v32, %v3308_v30 }
 0x14b   : > { %v2634_v11 = vpack.c.bf16 %v1336_v49, %v1316_v44  ;;  %v1067_v53 = vpop.f32.mrb[25].mxu1  ;;  %v1066_v57 = vadd.f32 %v1065_v50, %v3308_v30  ;;  %v1278_v9 = vmax.f32 %v977_v51, 0.0 }
 0x14c   : > { %v2632_v54 = vpack.c.bf16 %v1337_v46, %v1317_v42  ;;  %v982_v56 = vpop.f32.mrb[26].mxu0  ;;  %2625 = vmatprep.subr.bf16.mxu0 %v2624_v43  ;;  %v1068_v63 = vadd.f32 %v1067_v53, %v3308_v30  ;;  %v1279_v27 = vmax.f32 %v979_v55, 0.0 }
 0x14d   : > { %v983_v58 = vadd.f32 %v982_v56, %v3310_v5  ;;  %v984_v60 = vpop.f32.mrb[27].mxu0  ;;  %2627 = vmatpush1.bf16.msra.mxu0 %v2626_v45  ;;  %v1280_v19 = vmax.f32 %v1066_v57, 0.0 }
 0x14e   : > { %v1071_v2 = vpop.f32.mrb[26].mxu1  ;;  %2633 = vmatprep.subr.bf16.mxu1 %v2632_v54  ;;  %v985_v4 = vadd.f32 %v984_v60, %v3310_v5  ;;  %v1281_v16 = vmax.f32 %v1068_v63, 0.0 }
 0x14f   : > { %v1298_v17 = vmax.f32 %v983_v58, 0.0  ;;  %v1072_v21 = vadd.f32 %v1071_v2, %v3310_v5  ;;  %v1073_v23 = vpop.f32.mrb[27].mxu1  ;;  %2635 = vmatpush1.bf16.msra.mxu1 %v2634_v11 }
 0x150   : > { %v1299_v31 = vmax.f32 %v985_v4, 0.0  ;;  %v1074_v8 = vadd.f32 %v1073_v23, %v3310_v5  ;;  %v988_v12 = vpop.f32.mrb[28].mxu0  ;;  %2534 = vmatmul.mubr.msk.f32.vlgmr.msra.gmra.mrb[44].mxu0 %vm1346_vm2, %v3339_v28 }
 0x151   : > { %v2638_v35 = vpack.c.bf16 %v1298_v17, %v1278_v9  ;;  %v1300_v36 = vmax.f32 %v1072_v21, 0.0  ;;  %v990_v37 = vpop.f32.mrb[29].mxu0  ;;  %1840 = vmatprep.mubr.f32.mxu0 %v2842_v0  ;;  %v989_v14 = vadd.f32 %v988_v12, %v3314_v15 }
 0x152   : > { %v2636_v22 = vpack.c.bf16 %v1299_v31, %v1279_v27  ;;  %v1301_v26 = vmax.f32 %v1074_v8, 0.0  ;;  %v1077_v29 = vpop.f32.mrb[28].mxu1  ;;  %2535 = vmatmul.mubr.msk.f32.vlgmr.msra.gmra.mrb[44].mxu1 %vm1346_vm2, %v3339_v28  ;;  %v991_v44 = vadd.f32 %v990_v37, %v3314_v15 }
 0x153   : > { %v2646_v13 = vpack.c.bf16 %v1300_v36, %v1280_v19  ;;  %v1079_v20 = vpop.f32.mrb[29].mxu1  ;;  %1911 = vmatprep.mubr.f32.mxu1 %v2842_v0  ;;  %v1078_v49 = vadd.f32 %v1077_v29, %v3314_v15  ;;  %v1318_v11 = vmax.f32 %v989_v14, 0.0 }
 0x154   : > { %v2644_v24 = vpack.c.bf16 %v1301_v26, %v1281_v16  ;;  %v994_v45 = vpop.f32.mrb[30].mxu0  ;;  %2637 = vmatprep.subr.bf16.mxu0 %v2636_v22  ;;  %v1080_v43 = vadd.f32 %v1079_v20, %v3314_v15  ;;  %v1319_v55 = vmax.f32 %v991_v44, 0.0 }
 0x155   : > { %v995_v32 = vadd.f32 %v994_v45, %v3322_v18  ;;  %v996_v42 = vpop.f32.mrb[31].mxu0  ;;  %2639 = vmatpush1.bf16.msra.mxu0 %v2638_v35  ;;  %v1320_v60 = vmax.f32 %v1078_v49, 0.0 }
 0x156   : > { %v1083_v46 = vpop.f32.mrb[30].mxu1  ;;  %2645 = vmatprep.subr.bf16.mxu1 %v2644_v24  ;;  %v997_v50 = vadd.f32 %v996_v42, %v3322_v18  ;;  %v1321_v9 = vmax.f32 %v1080_v43, 0.0 }
 0x157   : > { %v1338_v51 = vmax.f32 %v995_v32, 0.0  ;;  %v1084_v53 = vadd.f32 %v1083_v46, %v3322_v18  ;;  %v1085_v54 = vpop.f32.mrb[31].mxu1  ;;  %2647 = vmatpush1.bf16.msra.mxu1 %v2646_v13 }
 0x158   : > { %v1339_v56 = vmax.f32 %v997_v50, 0.0  ;;  %v1086_v57 = vadd.f32 %v1085_v54, %v3322_v18  ;;  %v1154_v58 = vpop.f32.mrb[32].mxu0 }
 0x159   : > { %v2642_v63 = vpack.c.bf16 %v1338_v51, %v1318_v11  ;;  %v1340_v2 = vmax.f32 %v1084_v53, 0.0  ;;  %v1156_v4 = vpop.f32.mrb[33].mxu0  ;;  %v1155_v31 = vadd.f32 %v1154_v58, %v3308_v30 }
 0x15a   : > { %v2640_v17 = vpack.c.bf16 %v1339_v56, %v1319_v55  ;;  %v1341_v21 = vmax.f32 %v1086_v57, 0.0  ;;  %v1243_v23 = vpop.f32.mrb[32].mxu1  ;;  %v1157_v19 = vadd.f32 %v1156_v4, %v3308_v30 }
 0x15b   : > { %v2650_v27 = vpack.c.bf16 %v1340_v2, %v1320_v60  ;;  %v1245_v8 = vpop.f32.mrb[33].mxu1  ;;  %v1244_v36 = vadd.f32 %v1243_v23, %v3308_v30  ;;  %v1282_v13 = vmax.f32 %v1155_v31, 0.0 }
 0x15c   : > { %v2648_v12 = vpack.c.bf16 %v1341_v21, %v1321_v9  ;;  %v1160_v35 = vpop.f32.mrb[34].mxu0  ;;  %2641 = vmatprep.subr.bf16.mxu0 %v2640_v17  ;;  %v1246_v22 = vadd.f32 %v1245_v8, %v3308_v30  ;;  %v1283_v44 = vmax.f32 %v1157_v19, 0.0 }
 0x15d   : > { %v1161_v37 = vadd.f32 %v1160_v35, %v3310_v5  ;;  %v1162_v16 = vpop.f32.mrb[35].mxu0  ;;  %2643 = vmatpush1.bf16.msra.mxu0 %v2642_v63  ;;  %v1284_v42 = vmax.f32 %v1244_v36, 0.0 }
 0x15e   : > { %v1249_v26 = vpop.f32.mrb[34].mxu1  ;;  %2649 = vmatprep.subr.bf16.mxu1 %v2648_v12  ;;  %v1163_v29 = vadd.f32 %v1162_v16, %v3310_v5  ;;  %v1285_v50 = vmax.f32 %v1246_v22, 0.0 }
 0x15f   : > { %v1302_v14 = vmax.f32 %v1161_v37, 0.0  ;;  %v1250_v20 = vadd.f32 %v1249_v26, %v3310_v5  ;;  %v1251_v24 = vpop.f32.mrb[35].mxu1  ;;  %2651 = vmatpush1.bf16.msra.mxu1 %v2650_v27 }
 0x160   : > { %v1303_v45 = vmax.f32 %v1163_v29, 0.0  ;;  %v1252_v49 = vadd.f32 %v1251_v24, %v3310_v5  ;;  %v1166_v32 = vpop.f32.mrb[36].mxu0  ;;  %2536 = vmatmul.mubr.msk.f32.vlgmr.msra.gmra.mrb[46].mxu0 %vm1346_vm2, %v3339_v28  ;;  %v2089_v29 = vrot.slane %v3135_v48, 4 }
 0x161   : > { %v2654_v30 = vpack.c.bf16 %v1302_v14, %v1282_v13  ;;  %v1304_v43 = vmax.f32 %v1250_v20, 0.0  ;;  %v1168_v46 = vpop.f32.mrb[37].mxu0  ;;  %1982 = vmatprep.mubr.f32.mxu0 %v2842_v0  ;;  %v1167_v5 = vadd.f32 %v1166_v32, %v3314_v15  ;;  %v2110_v13 = vrot.slane %v3072_v62, 4 }
 0x162   : > { %v2652_v11 = vpack.c.bf16 %v1303_v45, %v1283_v44  ;;  %v1305_v51 = vmax.f32 %v1252_v49, 0.0  ;;  %v1255_v53 = vpop.f32.mrb[36].mxu1  ;;  %2537 = vmatmul.mubr.msk.f32.vlgmr.msra.gmra.mrb[46].mxu1 %vm1346_vm2, %v3339_v28  ;;  %v1169_v57 = vadd.f32 %v1168_v46, %v3314_v15  ;;  %v2103_v14 = vrot.slane %v3074_v3, 4 }
 0x163   : > { %v2662_v54 = vpack.c.bf16 %v1304_v43, %v1284_v42  ;;  %v1257_v55 = vpop.f32.mrb[37].mxu1  ;;  %2053 = vmatprep.mubr.f32.mxu1 %v2842_v0  ;;  %v1256_v60 = vadd.f32 %v1255_v53, %v3314_v15  ;;  %v1322_v21 = vmax.f32 %v1167_v5, 0.0  ;;  %v2090_v24 = vadd.f32 %v2089_v29, %v3135_v48 }
 0x164   : > { %v2660_v56 = vpack.c.bf16 %v1305_v51, %v1285_v50  ;;  %v1172_v58 = vpop.f32.mrb[38].mxu0  ;;  %2653 = vmatprep.subr.bf16.mxu0 %v2652_v11  ;;  %v1258_v4 = vadd.f32 %v1257_v55, %v3314_v15  ;;  %v1323_v31 = vmax.f32 %v1169_v57, 0.0  ;;  %v2111_v44 = vadd.f32 %v2110_v13, %v3072_v62 }
 0x165   : > { %v1173_v63 = vadd.f32 %v1172_v58, %v3322_v18  ;;  %v1174_v2 = vpop.f32.mrb[39].mxu0  ;;  %2655 = vmatpush1.bf16.msra.mxu0 %v2654_v30  ;;  %v1324_v19 = vmax.f32 %v1256_v60, 0.0  ;;  %v2104_v45 = vadd.f32 %v2103_v14, %v3074_v3  ;;  %v2091_v32 = vrot.slane %v2090_v24, 2 }
 0x166   : > { %v1261_v9 = vpop.f32.mrb[38].mxu1  ;;  %2661 = vmatprep.subr.bf16.mxu1 %v2660_v56  ;;  %v1175_v17 = vadd.f32 %v1174_v2, %v3322_v18  ;;  %v1325_v37 = vmax.f32 %v1258_v4, 0.0  ;;  %v2112_v42 = vrot.slane %v2111_v44, 2  ;;  %v2124_v50 = vrot.slane %v3162_v61, 4 }
 0x167   : > { %v1342_v23 = vmax.f32 %v1173_v63, 0.0  ;;  %v1262_v0 = vadd.f32 %v1261_v9, %v3322_v18  ;;  %v1263_v27 = vpop.f32.mrb[39].mxu1  ;;  %2663 = vmatpush1.bf16.msra.mxu1 %v2662_v54  ;;  %v2092_v43 = vadd.f32 %v2091_v32, %v2090_v24  ;;  %v2117_v51 = vrot.slane %v3165_v1, 4 }
 0x168   : > { %v1343_v8 = vmax.f32 %v1175_v17, 0.0  ;;  %v1264_v12 = vadd.f32 %v1263_v27, %v3322_v18  ;;  %v2096_v18 = vrot.slane %v3114_v41, 4  ;;  %v2113_v46 = vadd.f32 %v2112_v42, %v2111_v44 }
 0x169   : > { %v2658_v35 = vpack.c.bf16 %v1342_v23, %v1322_v21  ;;  %v1344_v36 = vmax.f32 %v1262_v0, 0.0  ;;  %v2138_v48 = vrot.slane %v3142_v52, 4  ;;  %v2125_v62 = vadd.f32 %v2124_v50, %v3162_v61 }
 0x16a   : > { %v2656_v16 = vpack.c.bf16 %v1343_v8, %v1323_v31  ;;  %v1345_v15 = vmax.f32 %v1264_v12, 0.0  ;;  %v2097_v20 = vadd.f32 %v2096_v18, %v3114_v41  ;;  %v2093_v41 = vrot.slane %v2092_v43, 1 }
 0x16b   : > { %v2666_v22 = vpack.c.bf16 %v1344_v36, %v1324_v19  ;;  %v2114_v54 = vrot.slane %v2113_v46, 1  ;;  %v2131_v5 = vrot.slane %v3158_v59, 4  ;;  %v2118_v55 = vadd.f32 %v2117_v51, %v3165_v1 }
 0x16c   : > { %v2664_v26 = vpack.c.bf16 %v1345_v15, %v1325_v37  ;;  %2657 = vmatprep.subr.bf16.mxu0 %v2656_v16  ;;  %v2098_v49 = vrot.slane %v2097_v20, 2  ;;  %v2094_v57 = vadd.f32 %v2093_v41, %v2092_v43  ;;  %v2139_v58 = vadd.f32 %v2138_v48, %v3142_v52 }
 0x16d   : > { %2659 = vmatpush1.bf16.msra.mxu0 %v2658_v35  ;;  %v2115_v60 = vadd.f32 %v2114_v54, %v2113_v46  ;;  %v2126_v63 = vrot.slane %v2125_v62, 2  ;;  %v2132_v2 = vadd.f32 %v2131_v5, %v3158_v59  ;;  %v2119_v4 = vrot.slane %v2118_v55, 2 }
 0x16e   : > { %2665 = vmatprep.subr.bf16.mxu1 %v2664_v26  ;;  %v2099_v30 = vadd.f32 %v2098_v49, %v2097_v20  ;;  %v2140_v17 = vrot.slane %v2139_v58, 2  ;;  %v2273_v61 = vsel %vm2251_vm3, %v3133_v47, %v2094_v57  ;;  %v2152_v8 = vrot.slane %v3202_v33, 4 }
 0x16f   : > { %2667 = vmatpush1.bf16.msra.mxu1 %v2666_v22  ;;  %v2127_v52 = vadd.f32 %v2126_v63, %v2125_v62  ;;  %v2133_v0 = vrot.slane %v2132_v2, 2  ;;  %v2120_v27 = vadd.f32 %v2119_v4, %v2118_v55  ;;  %v2145_v35 = vrot.slane %v3206_v34, 4 }
 0x170   : > { %2538 = vmatmul.mubr.msk.f32.vlgmr.msra.gmra.mrb[48].mxu0 %vm1346_vm2, %v3339_v28  ;;  %v2100_v53 = vrot.slane %v2099_v30, 1  ;;  %v2141_v31 = vadd.f32 %v2140_v17, %v2139_v58  ;;  %v2153_v37 = vadd.f32 %v2152_v8, %v3202_v33  ;;  %v2187_v32 = vrot.slane %v3224_v39, 4 }
 0x171   : > { %v2128_v59 = vrot.slane %v2127_v52, 1  ;;  %v2134_v12 = vadd.f32 %v2133_v0, %v2132_v2  ;;  %v2121_v19 = vrot.slane %v2120_v27, 1  ;;  %v2146_v16 = vadd.f32 %v2145_v35, %v3206_v34 }
 0x172   : > { %2539 = vmatmul.mubr.msk.f32.vlgmr.msra.gmra.mrb[48].mxu1 %vm1346_vm2, %v3339_v28  ;;  %v2105_v28 = vrot.slane %v2104_v45, 2  ;;  %v2101_v56 = vadd.f32 %v2100_v53, %v2099_v30  ;;  %v2142_v36 = vrot.slane %v2141_v31, 1  ;;  %v2154_v26 = vrot.slane %v2153_v37, 2 }
 0x173   : > { %v2129_v47 = vadd.f32 %v2128_v59, %v2127_v52  ;;  %v2122_v15 = vadd.f32 %v2121_v19, %v2120_v27  ;;  %v2147_v13 = vrot.slane %v2146_v16, 2  ;;  %v2166_v34 = vrot.slane %v3177_v10, 4 }
 0x174   : > { %v2106_v11 = vadd.f32 %v2105_v28, %v2104_v45  ;;  %v2274_v21 = vsel %vm2251_vm3, %v3112_v38, %v2101_v56  ;;  %v2135_v38 = vrot.slane %v2134_v12, 1  ;;  %v2143_v22 = vadd.f32 %v2142_v36, %v2141_v31 }
 0x175   : > { %v2276_v23 = vsel %vm2254_vm4, %v2274_v21, %v2115_v60  ;;  %v2155_v44 = vadd.f32 %v2154_v26, %v2153_v37  ;;  %v2148_v33 = vadd.f32 %v2147_v13, %v2146_v16  ;;  %v2173_v42 = vrot.slane %v3248_v40, 4 }
 0x176   : > { %v2107_v3 = vrot.slane %v2106_v11, 1  ;;  %v2278_v29 = vsel %vm2257_vm5, %v2276_v23, %v2129_v47  ;;  %v2136_v14 = vadd.f32 %v2135_v38, %v2134_v12  ;;  %v2159_v30 = vrot.slane %v3190_v25, 4 }
 0x177   : > { %v2280_v20 = vsel %vm2260_vm6, %v2278_v29, %v2143_v22  ;;  %v2156_v45 = vrot.slane %v2155_v44, 1  ;;  %v2149_v49 = vrot.slane %v2148_v33, 1  ;;  %v2167_v46 = vadd.f32 %v2166_v34, %v3177_v10 }
 0x178   : > { %v2108_v9 = vadd.f32 %v2107_v3, %v2106_v11  ;;  %v2188_v50 = vadd.f32 %v2187_v32, %v3224_v39  ;;  %v2174_v11 = vadd.f32 %v2173_v42, %v3248_v40  ;;  %v2160_v41 = vadd.f32 %v2159_v30, %v3190_v25 }
 0x179   : > { %v2157_v28 = vadd.f32 %v2156_v45, %v2155_v44  ;;  %v2150_v43 = vadd.f32 %v2149_v49, %v2148_v33  ;;  %v2168_v48 = vrot.slane %v2167_v46, 2  ;;  %v2180_v21 = vrot.slane %v3237_v7, 4 }
 0x17a   : > { %v2275_v1 = vsel %vm2254_vm4, %v2273_v61, %v2108_v9  ;;  %v2189_v54 = vrot.slane %v2188_v50, 2  ;;  %v2175_v62 = vrot.slane %v2174_v11, 2  ;;  %v2161_v3 = vrot.slane %v2160_v41, 2 }
 0x17b   : > { %v2277_v18 = vsel %vm2257_vm5, %v2275_v1, %v2122_v15  ;;  %v2282_v53 = vsel %vm2263_vm7, %v2280_v20, %v2157_v28  ;;  %v2169_v5 = vadd.f32 %v2168_v48, %v2167_v46  ;;  %v2194_v61 = vrot.slane %v3220_v6, 4 }
 0x17c   : > { %v2279_v24 = vsel %vm2260_vm6, %v2277_v18, %v2136_v14  ;;  %v2190_v55 = vadd.f32 %v2189_v54, %v2188_v50  ;;  %v2176_v56 = vadd.f32 %v2175_v62, %v2174_v11  ;;  %v2162_v57 = vadd.f32 %v2161_v3, %v2160_v41 }
 0x17d   : > { %v2281_v51 = vsel %vm2263_vm7, %v2279_v24, %v2150_v43  ;;  %v2170_v10 = vrot.slane %v2169_v5, 1  ;;  %v2195_v1 = vadd.f32 %v2194_v61, %v3220_v6  ;;  %v2181_v23 = vadd.f32 %v2180_v21, %v3237_v7 }
 0x17e   : > { %v2191_v58 = vrot.slane %v2190_v55, 1  ;;  %v2177_v39 = vrot.slane %v2176_v56, 1  ;;  %v2163_v60 = vrot.slane %v2162_v57, 1 }
 0x17f   : > { %v2171_v40 = vadd.f32 %v2170_v10, %v2169_v5  ;;  %v2196_v52 = vrot.slane %v2195_v1, 2  ;;  %v2182_v0 = vrot.slane %v2181_v23, 2 }
 0x180   : > { %v2192_v63 = vadd.f32 %v2191_v58, %v2190_v55  ;;  %v2178_v2 = vadd.f32 %v2177_v39, %v2176_v56  ;;  %v2164_v4 = vadd.f32 %v2163_v60, %v2162_v57 }
 0x181   : > { %v3470_v9 = vsel %vm2266_vm8, %v2282_v53, %v2171_v40  ;;  %v2197_v27 = vadd.f32 %v2196_v52, %v2195_v1  ;;  %v2183_v31 = vadd.f32 %v2182_v0, %v2181_v23 }
 0x182   : > { %v3473_v25 = vsel %vm2248_vm1, %v2178_v2, %v2192_v63  ;;  %v3476_v17 = vsel %vm2266_vm8, %v2281_v51, %v2164_v4 }
 0x183   : > { %v2198_v59 = vrot.slane %v2197_v27, 1  ;;  %v2184_v8 = vrot.slane %v2183_v31, 1 }
 0x185   : > { %v2199_v12 = vadd.f32 %v2198_v59, %v2197_v27  ;;  %v2185_v19 = vadd.f32 %v2184_v8, %v2183_v31 }
 0x187   : > { %v3483_v47 = vsel %vm2248_vm1, %v2185_v19, %v2199_v12 }
 0x203   : > { %v1416_v35 = vpop.f32.mrb[40].mxu0 }
 0x204   : > { %v1418_v36 = vpop.f32.mrb[41].mxu0  ;;  %v1487_v37 = vpop.f32.mrb[40].mxu1 }
 0x205   : > { %v2202_v38 = vrot.slane %v1487_v37, 7  ;;  %v1489_v16 = vpop.f32.mrb[41].mxu1 }
 0x206   : > { %v2203_v15 = vrot.slane %v1489_v16, 7 }
 0x207   : > { %v2249_v6 = vsel %vm2248_vm1, %v1416_v35, %v2202_v38 }
 0x208   : > { %v2250_v7 = vsel %vm2248_vm1, %v1418_v36, %v2203_v15 }
 0x213   : > { %v1558_v22 = vpop.f32.mrb[42].mxu0 }
 0x214   : > { %v2208_v26 = vrot.slane %v1558_v22, 6  ;;  %v1560_v18 = vpop.f32.mrb[43].mxu0  ;;  %v1629_v13 = vpop.f32.mrb[42].mxu1 }
 0x215   : > { %v2209_v29 = vrot.slane %v1560_v18, 6  ;;  %v2214_v20 = vrot.slane %v1629_v13, 5  ;;  %v1631_v24 = vpop.f32.mrb[43].mxu1 }
 0x216   : > { %v2252_v14 = vsel %vm2251_vm3, %v2249_v6, %v2208_v26  ;;  %v2215_v33 = vrot.slane %v1631_v24, 5 }
 0x217   : > { %v2253_v44 = vsel %vm2251_vm3, %v2250_v7, %v2209_v29  ;;  %v2255_v45 = vsel %vm2254_vm4, %v2252_v14, %v2214_v20 }
 0x218   : > { %v2256_v49 = vsel %vm2254_vm4, %v2253_v44, %v2215_v33 }
 0x223   : > { %v1700_v34 = vpop.f32.mrb[44].mxu0 }
 0x224   : > { %v2220_v32 = vrot.slane %v1700_v34, 4  ;;  %v1702_v42 = vpop.f32.mrb[45].mxu0 }
 0x225   : > { %v2221_v28 = vrot.slane %v1702_v42, 4  ;;  %v1771_v30 = vpop.f32.mrb[44].mxu1 }
 0x226   : > { %v2258_v43 = vsel %vm2257_vm5, %v2255_v45, %v2220_v32  ;;  %v2226_v46 = vrot.slane %v1771_v30, 3  ;;  %v1773_v50 = vpop.f32.mrb[45].mxu1 }
 0x227   : > { %v2259_v11 = vsel %vm2257_vm5, %v2256_v49, %v2221_v28  ;;  %v2227_v51 = vrot.slane %v1773_v50, 3 }
 0x228   : > { %v2261_v53 = vsel %vm2260_vm6, %v2258_v43, %v2226_v46 }
 0x229   : > { %v2262_v41 = vsel %vm2260_vm6, %v2259_v11, %v2227_v51 }
 0x233   : > { %v1842_v48 = vpop.f32.mrb[46].mxu0 }
 0x234   : > { %v2232_v54 = vrot.slane %v1842_v48, 2  ;;  %v1844_v62 = vpop.f32.mrb[47].mxu0 }
 0x235   : > { %v2233_v3 = vrot.slane %v1844_v62, 2  ;;  %v1913_v5 = vpop.f32.mrb[46].mxu1 }
 0x236   : > { %v2264_v55 = vsel %vm2263_vm7, %v2261_v53, %v2232_v54  ;;  %v2238_v56 = vrot.slane %v1913_v5, 1  ;;  %v1915_v57 = vpop.f32.mrb[47].mxu1 }
 0x237   : > { %v2265_v10 = vsel %vm2263_vm7, %v2262_v41, %v2233_v3  ;;  %v2239_v58 = vrot.slane %v1915_v57, 1 }
 0x238   : > { %v2267_v39 = vsel %vm2266_vm8, %v2264_v55, %v2238_v56 }
 0x239   : > { %v2268_v60 = vsel %vm2266_vm8, %v2265_v10, %v2239_v58 }
 0x243   : > { %v1984_v40 = vpop.f32.mrb[48].mxu0 }
 0x244   : > { %v1986_v63 = vpop.f32.mrb[49].mxu0 }
 0x245   : > { %v2055_v2 = vpop.f32.mrb[48].mxu1 }
 0x246   : > { %v2244_v4 = vrot.slane %v2055_v2, 7  ;;  %v2057_v61 = vpop.f32.mrb[49].mxu1 }
 0x247   : > { %v2245_v21 = vrot.slane %v2057_v61, 7 }
 0x248   : > { %v2269_v1 = vsel %vm2248_vm1, %v1984_v40, %v2244_v4 }
 0x249   : > { %v2287_v23 = vsel %vm2251_vm3, %v2269_v1, -inf  ;;  %v2270_v52 = vsel %vm2248_vm1, %v1986_v63, %v2245_v21 }
 0x24a   : > { %v2288_v0 = vmax.f32 %v2267_v39, %v2287_v23  ;;  %v2295_v27 = vsel %vm2251_vm3, %v2270_v52, -inf }
 0x24b   : > { %v2296_v31 = vmax.f32 %v2268_v60, %v2295_v27  ;;  %v2844_v27 = vmov 1966171168  }
 0x24c   : > { %v2289_v59 = vrot.slane %v2288_v0, 4 }
 0x24d   : > { %v2297_v8 = vrot.slane %v2296_v31, 4 }
 0x24e   : > { %v2290_v12 = vmax.f32 %v2288_v0, %v2289_v59 }
 0x24f   : > { %v2298_v19 = vmax.f32 %v2296_v31, %v2297_v8  ;;  %v2364_v31 = vlaneseq }
 0x250   : > { %v2291_v35 = vrot.slane %v2290_v12, 2 }
 0x251   : > { %v2299_v36 = vrot.slane %v2298_v19, 2  ;;  %vm2385_vm9 = vcmp.lt.s32.totalorder %v2364_v31, 256 }
 0x252   : > { %v2292_v37 = vmax.f32 %v2290_v12, %v2291_v35 }
 0x253   : > { %v2300_v38 = vmax.f32 %v2298_v19, %v2299_v36 }
 0x254   : > { %v2293_v16 = vrot.slane %v2292_v37, 1 }
 0x255   : > { %v2301_v15 = vrot.slane %v2300_v38, 1 }
 0x256   : > { %v2294_v6 = vmax.f32 %v2292_v37, %v2293_v16 }
 0x257   : > { %v2302_v7 = vmax.f32 %v2300_v38, %v2301_v15 }
 0x258   : > { %v2303_v22 = vsub.f32 %v2267_v39, %v2294_v6  ;;  %v2305_v26 = vsub.f32 %v2269_v1, %v2294_v6  ;;  %v2357_v6 = vld [vmem:[%s261_s8] sm:$0x3] }
 0x259   : > { %v2304_v18 = vsub.f32 %v2268_v60, %v2302_v7  ;;  %v2306_v29 = vsub.f32 %v2270_v52, %v2302_v7 }
 0x25a   : > { %v2307_v13 = vmul.f32 1.442695, %v2303_v22  ;;  %v2311_v14 = vmul.f32 1.442695, %v2305_v26 }
 0x25b   : > { %v2309_v20 = vmul.f32 1.442695, %v2304_v18  ;;  %v2313_v24 = vmul.f32 1.442695, %v2306_v29 }
 0x25c   : > { %2724 = vpow2.f32 %v2307_v13 }
 0x25d   : > { %2726 = vpow2.f32 %v2311_v14 }
 0x25e   : > { %2728 = vpow2.f32 %v2309_v20 }
 0x25f   : > { %2730 = vpow2.f32 %v2313_v24 }
 0x266   : > { %v2725_v44 = vpop.eup %2724 }
 0x267   : > { %v2727_v33 = vpop.eup %2726 }
 0x268   : > { %v2729_v45 = vpop.eup %2728  ;;  %v2315_v49 = vsel %vm2251_vm3, %v2727_v33, 0.0 }
 0x269   : > { %v2731_v34 = vpop.eup %2730  ;;  %v2316_v32 = vadd.f32 %v2725_v44, %v2315_v49 }
 0x26a   : > { %v2323_v42 = vsel %vm2251_vm3, %v2731_v34, 0.0 }
 0x26b   : > { %v2317_v28 = vrot.slane %v2316_v32, 4  ;;  %v2324_v30 = vadd.f32 %v2729_v45, %v2323_v42 }
 0x26d   : > { %v2318_v43 = vadd.f32 %v2317_v28, %v2316_v32  ;;  %v2325_v46 = vrot.slane %v2324_v30, 4 }
 0x26f   : > { %v2319_v50 = vrot.slane %v2318_v43, 2  ;;  %v2326_v11 = vadd.f32 %v2325_v46, %v2324_v30 }
 0x271   : > { %v2320_v51 = vadd.f32 %v2319_v50, %v2318_v43  ;;  %v2327_v53 = vrot.slane %v2326_v11, 2 }
 0x273   : > { %v2321_v41 = vrot.slane %v2320_v51, 1  ;;  %v2328_v48 = vadd.f32 %v2327_v53, %v2326_v11 }
 0x275   : > { %v2322_v54 = vadd.f32 %v2321_v41, %v2320_v51  ;;  %v2329_v62 = vrot.slane %v2328_v48, 1 }
 0x277   : > { %2732 = vrcp.f32 %v2322_v54  ;;  %v2330_v3 = vadd.f32 %v2329_v62, %v2328_v48 }
 0x279   : > { %2734 = vrcp.f32 %v2330_v3 }
 0x281   : > { %v2733_v5 = vpop.eup %2732 }
 0x282   : > { %v2333_v55 = vmul.f32 %v2733_v5, %v2725_v44  ;;  %v2335_v56 = vmul.f32 %v2733_v5, %v2727_v33 }
 0x283   : > { %v2735_v57 = vpop.eup %2734 }
 0x284   : > { %v2337_v10 = vmul.f32 %v2333_v55, %v3476_v17  ;;  %v2339_v58 = vmul.f32 %v2335_v56, %v3473_v25  ;;  %v2334_v39 = vmul.f32 %v2735_v57, %v2729_v45  ;;  %v2336_v60 = vmul.f32 %v2735_v57, %v2731_v34 }
 0x285   : > { %v2362_v25 = vunpack.c.l.s4 %v2844_v27 }
 0x286   : > { %v2341_v40 = vsel %vm2251_vm3, %v2339_v58, 0.0  ;;  %v2338_v63 = vmul.f32 %v2334_v39, %v3470_v9  ;;  %v2340_v2 = vmul.f32 %v2336_v60, %v3483_v47  ;;  %v2365_v47 = vshrl.u32 %v2364_v31, 7 }
 0x287   : > { %v2342_v4 = vadd.f32 %v2341_v40, %v2337_v10  ;;  %v2363_v19 = vunpack.c.0.s8 %v2362_v25 }
 0x288   : > { %v2349_v61 = vsel %vm2251_vm3, %v2340_v2, 0.0 }
 0x289   : > { %v2343_v21 = vrot.slane %v2342_v4, 4  ;;  %v2350_v1 = vadd.f32 %v2349_v61, %v2338_v63  ;;  %v2366_v38 = vsub.s32 %v2363_v19, %v2365_v47 }
 0x28b   : > { %v2344_v23 = vadd.f32 %v2343_v21, %v2342_v4  ;;  %v2351_v52 = vrot.slane %v2350_v1, 4 }
 0x28d   : > { %v2345_v0 = vrot.slane %v2344_v23, 2  ;;  %v2352_v17 = vadd.f32 %v2351_v52, %v2350_v1 }
 0x28f   : > { %v2346_v59 = vadd.f32 %v2345_v0, %v2344_v23  ;;  %v2353_v8 = vrot.slane %v2352_v17, 2 }
 0x291   : > { %v2347_v12 = vrot.slane %v2346_v59, 1  ;;  %v2354_v9 = vadd.f32 %v2353_v8, %v2352_v17 }
 0x293   : > { %v2348_v35 = vadd.f32 %v2347_v12, %v2346_v59  ;;  %v2355_v36 = vrot.slane %v2354_v9, 1 }
 0x295   : > { %v2356_v37 = vadd.f32 %v2355_v36, %v2354_v9 }
 0x297   : > { %v2360_v16 = vcombine.low %v2348_v35, %v2356_v37 }
 0x299   : > { %v2367_v15 = vrot.slane %v2360_v16, %v2366_v38 }
 0x29b   : > { %v2374_v7 = vrot.slane %v2367_v15, %v2366_v38 }
 0x29d   : > { %v2376_v22 = vadd.f32 %v2374_v7, %v2357_v6 }
 0x29f   : > { %v2540_v26 = vmul.f32 -1.442695, %v2376_v22 }
 0x2a1   : > { %2736 = vpow2.f32 %v2540_v26 }
 0x2ab   : > { %v2737_v18 = vpop.eup %2736 }
 0x2ac   : > { %v2380_v29 = vadd.f32 1.0, %v2737_v18 }
 0x2ae   : > { %2738 = vrcp.f32 %v2380_v29 }
 0x2b8   : > { %v2739_v13 = vpop.eup %2738 }
 0x2b9   : > { %2387 = vst.msk [vmem:[%s256_s13] sm:$0x3] %vm2385_vm9, %v2739_v13 }
 0x2ba   : > { %2783 = shalt.err (!%p2780_p5)
}
 0x2bb   : > { %s2784_s23 = scalar_lea.hbm %s3520_s26, 32  ;;  %s2788_s6 = scalar_lea.hbm %s3569_s5, 64 }
 0x2bc   : > { %p2785_p7 = scmp.ne.s32.totalorder %s3520_s26, %s2784_s23  ;;  %p2789_p0 = scmp.lt.u32.totalorder %s3520_s26, %s3569_s5 }
 0x2bd   : > { %p2790_p2 = scmp.lt.u32.totalorder %s2788_s6, %s2784_s23  ;;  %p2792_p11 = scmp.lt.u32.totalorder %s2784_s23, %s3520_s26 }
 0x2be   : > { %p2786_p8 = pnand %p2785_p7, %p3576_p12 }
 0x2bf   : > { %p2791_p6 = por %p2790_p2, %p2789_p0 }
 0x2c0   : > { %p2787_p9 = pneg %p2786_p8 }
 0x2c1   : > { %p2793_p13 = por %p2792_p11, %p2791_p6 }
 0x2c3   : > { %p2794_p4 = pnand %p2793_p13, %p2787_p9 }
 0x2c5   : > { %2797 = shalt.err (!%p2794_p4)
}
 0x2c6   : > { %2672 = dma.vmem_to_hbm [thread:$0]  (%p3576_p12), %s3522_s16, 32, %s3520_s26, %s2389_s7  }
 0x2c7 PF: > { %s2415_s10 = sand.u32 1, %s2824_s18   ;;  %p3577_p10 = scmp.ne.s32.totalorder %s3573_s30, 0 }
 0x2c8   : > { %p3578_p1 = scmp.ge.s32.totalorder %s2836_s21, 2  ;;  %s2416_s13 = scalar_lea.sflag [#allocation4], %s2415_s10 }
 0x2ca   : > { %p2679_p3 = pnand %p3578_p1, %p3577_p10 }
 0x2cc   : > { %2819 = dma.done.wait (!%p2679_p3), %s2416_s13, 32  }
 0x2cd   : > { %2821 = vsyncadd (!%p2679_p3), %s2416_s13, 4294967264  ;;  %p18_p5 = scmp.ge.s32.totalorder %s2901_s24, 4   ;;  %s3579_s18 = smov %s2828_s19 }
 0x2ce   : > { %s3580_s19 = smov %s2832_s20  ;;  %s3581_s20 = smov %s2913_s27 }
 0x2cf   : > { %s3582_s21 = smov %s2901_s24  ;;  %20 = sbr.rel (!%p18_p5) target bundleno = 5 (0x5), region = 88 }
 0x2d6   :  { %2421 = vsyncpa [#allocation3], 1 }
 0x2d7   :  { %2423 = vsyncpa [#allocation3 + $0x1], 1 }
 0x2d8   :  { %2424 = vsyncpa [#allocation4], 1 }
 0x2d9   :  { %2426 = vsyncpa [#allocation4 + $0x1], 1 }

</bundles_post_ra>
